<compile_context>
chip_gen: v6e
topology: v6e:2x2x1
jax: 0.10.0
libtpu: 0.0.40
codegen_flags: <defaults>
</compile_context>

<pallas_src>
import functools
import math

import jax
import jax.numpy as jnp
from jax.experimental import pallas as pl
from jax.experimental.pallas import tpu as pltpu


# ------------------------------ fused kernel ------------------------------- #

def _encoder_kernel(patches_ref, wts_ref, cst_ref, o_ref, *,
                    B, S, E, H, Dh, num_layers, scale, w_off, c_off, eps=1e-5):
    BS = B * S
    HB = H * BS
    bf16 = jnp.bfloat16
    f32 = jnp.float32

    def w(name):                      # static slice of the packed bf16 weight buffer
        r0, nr, nc = w_off[name]
        return wts_ref[r0:r0 + nr, 0:nc]

    def c(name):                      # static slice of the packed f32 constants buffer
        r0, nr, nc = c_off[name]
        return cst_ref[r0:r0 + nr, 0:nc]

    # Patch embedding + positional encoding (embedding bias pre-folded into pe_b).
    x = jnp.dot(patches_ref[...].astype(bf16), w("emb_w"),
                preferred_element_type=f32) + c("pe_b")                      # (BS, E)

    attn_bias = c("attn_bias")        # (HB, HB): 0 / -1e30, block-diag over (head,batch)
    sel = w("sel")                    # (H*BS, HB) 0/1 selection rows (torch .view gather)

    for l in range(num_layers):       # static unrolled (num_layers = 2)
        # Fused QKV projection; weight columns pre-permuted head-major [Qh|Kh|Vh]*H.
        qkv = jnp.dot(x.astype(bf16), w(f"wqkv{l}"),
                      preferred_element_type=f32) + c(f"bqkv{l}")            # (BS, 3E)

        # Stack heads along sublanes: all heads & batch elements share one attention.
        blk = 3 * Dh
        qkv_s = jnp.concatenate(
            [qkv[:, h * blk:(h + 1) * blk] for h in range(H)], axis=0)       # (HB, 3Dh)
        q = qkv_s[:, 0:Dh].astype(bf16)
        k = qkv_s[:, Dh:2 * Dh].astype(bf16)
        v = qkv_s[:, 2 * Dh:3 * Dh].astype(bf16)

        # One score matmul for every (head, batch); K consumed untransposed.
        s = jax.lax.dot_general(q, k, (((1,), (1,)), ((), ())),
                                preferred_element_type=f32) * scale + attn_bias
        m = jnp.max(s, axis=-1, keepdims=True)
        p = jnp.exp(s - m)
        p = p * pl.reciprocal(jnp.sum(p, axis=-1, keepdims=True), approx=True)
        ctx = jnp.dot(p.astype(bf16), v, preferred_element_type=f32)         # (HB, Dh)

        # torch's raw-memory .view(B,S,E) followed by concat_proj:
        #   p_all = ctx @ [Wp_0 | Wp_1 | Wp_2 | Wp_3]   (lane-dense (HB, H*E))
        #   proj  = bp + sum_a sel_a @ p_all[:, a*E:(a+1)*E]   (chained accumulate)
        p_all = jnp.dot(ctx.astype(bf16), w(f"wpw{l}"),
                        preferred_element_type=f32)                          # (HB, H*E)
        ln = c(f"lnv{l}")                                                    # (4,E): bp,g,b,b2
        proj = ln[0:1, :]
        for a in range(H):
            proj = proj + jnp.dot(sel[a * BS:(a + 1) * BS, :],
                                  p_all[:, a * E:(a + 1) * E].astype(bf16),
                                  preferred_element_type=f32)                # (BS, E)

        # attn_dropout: identity (inference). Residual + LayerNorm (f32).
        y = proj + x
        mean = jnp.mean(y, axis=-1, keepdims=True)
        var = jnp.mean((y - mean) ** 2, axis=-1, keepdims=True)
        yn = (y - mean) * jax.lax.rsqrt(var + eps) * ln[1:2, :] + ln[2:3, :]

        # Feed-forward (both ff dropouts are identity).
        h1 = jnp.maximum(
            jnp.dot(yn.astype(bf16), w(f"w1{l}"),
                    preferred_element_type=f32) + c(f"b1{l}"), 0.0)
        x = jnp.dot(h1.astype(bf16), w(f"w2{l}"),
                    preferred_element_type=f32) + ln[3:4, :]

    o_ref[...] = x


# ------------------------------ param packing ------------------------------ #

def _pack(entries, dtype, row_align):
    """Pack a list of (name, 2D array [c<=128]) into one (R,128) buffer + offsets."""
    offsets = {}
    pieces = []
    row = 0
    for name, arr in entries:
        arr = jnp.asarray(arr).astype(dtype)
        r, ccol = arr.shape
        offsets[name] = (row, r, ccol)
        rp = ((r + row_align - 1) // row_align) * row_align
        pieces.append(jnp.pad(arr, ((0, rp - r), (0, 128 - ccol))))
        row += rp
    return jnp.concatenate(pieces, axis=0), offsets


def prepare_encoder_params(embed_p, layer_ps, pe, batch_size, num_heads):
    """Build the two packed VMEM buffers (bf16 weights, f32 constants) once."""
    S, E = pe.shape
    B, H = batch_size, num_heads
    Dh = E // H
    BS, HB = B * S, H * B * S
    L = len(layer_ps)

    # ---------------- f32 constants ----------------
    cst_list = [("pe_b", jnp.tile(pe + embed_p["b"], (B, 1)))]               # (BS, E)

    r = jnp.arange(HB, dtype=jnp.int32)
    head = r // BS
    bat = (r % BS) // S
    same = (head[:, None] == head[None, :]) & (bat[:, None] == bat[None, :])
    cst_list.append(("attn_bias",
                     jnp.where(same, 0.0, -1e30).astype(jnp.float32)))       # (HB, HB)

    # ---------------- bf16 weights ----------------
    wts_list = [("emb_w", embed_p["w_T"])]                                   # (P, E)

    # Selection rows realizing torch's head-major .view(B,S,E) before concat_proj:
    # view[b*S+s, a*Dh+d] == ctx_stack[h*BS + b*S + s', d], (h,s') = divmod(s*H+a, S)
    i = jnp.arange(BS, dtype=jnp.int32)
    b_i, s_i = i // S, i % S
    sel_rows = []
    for a in range(H):
        t = s_i * H + a
        col = (t // S) * BS + b_i * S + (t % S)
        sel_rows.append((col[:, None] == jnp.arange(HB, dtype=jnp.int32)[None, :])
                        .astype(jnp.float32))
    wts_list.append(("sel", jnp.concatenate(sel_rows, axis=0)))              # (H*BS, HB)

    for l, p in enumerate(layer_ps):
        wqkv, bqkv = p["wqkv_T"], p["bqkv"]
        # head-major column order: per head h -> [Q_h | K_h | V_h] (3*Dh lanes each)
        wq_cols, bq_cols = [], []
        for h in range(H):
            for part in range(3):
                c0 = part * E + h * Dh
                wq_cols.append(wqkv[:, c0:c0 + Dh])
                bq_cols.append(bqkv[:, c0:c0 + Dh])
        wts_list.append((f"wqkv{l}", jnp.concatenate(wq_cols, axis=1)))      # (E, 3E)
        cst_list.append((f"bqkv{l}", jnp.concatenate(bq_cols, axis=1)))      # (1, 3E)

        # wide concat-proj weight: Wp_wide[:, a*E:(a+1)*E] = WpT[a*Dh:(a+1)*Dh, :]
        wts_list.append((f"wpw{l}", jnp.concatenate(
            [p["wp_T"][a * Dh:(a + 1) * Dh, :] for a in range(H)], axis=1)))  # (Dh, H*E)

        wts_list.append((f"w1{l}", p["w1_T"]))                               # (E, FF)
        wts_list.append((f"w2{l}", p["w2_T"]))                               # (FF, E)
        cst_list.append((f"lnv{l}", jnp.concatenate(
            [p["bp"], p["gamma"], p["beta"], p["b2"]], axis=0)))             # (4, E)
        cst_list.append((f"b1{l}", p["b1"]))                                 # (1, FF)

    wts, w_off = _pack(wts_list, jnp.bfloat16, 16)
    cst, c_off = _pack(cst_list, jnp.float32, 8)
    return {"wts": wts, "w_off": w_off, "cst": cst, "c_off": c_off,
            "dims": (B, S, E, H, Dh, L)}


# --------------------------------- wrapper ---------------------------------- #

def encoder_forward(patches, prep):
    B, S, E, H, Dh, L = prep["dims"]
    scale = 1.0 / math.sqrt(E)            # module divides by embed_dim ** 0.5
    patches_flat = patches.reshape(B * S, -1)

    def full(shape):
        n = len(shape)
        return pl.BlockSpec(shape, lambda i, _n=n: (0,) * _n)

    args = (patches_flat, prep["wts"], prep["cst"])
    out_flat = pl.pallas_call(
        functools.partial(_encoder_kernel, B=B, S=S, E=E, H=H, Dh=Dh,
                          num_layers=L, scale=scale,
                          w_off=prep["w_off"], c_off=prep["c_off"]),
        out_shape=jax.ShapeDtypeStruct((B * S, E), jnp.float32),
        grid=(1,),
        in_specs=[full(a.shape) for a in args],
        out_specs=pl.BlockSpec((B * S, E), lambda i: (0, 0)),
        compiler_params=pltpu.CompilerParams(dimension_semantics=("arbitrary",)),
    )(*args)
    return out_flat.reshape(B, S, E)      # free leading-dim split


# -------------------------- params / reference ----------------------------- #

def sinusoidal_pe(num_patches, embed_dim):
    pos = jnp.arange(num_patches, dtype=jnp.float32)[:, None]
    div = jnp.exp(jnp.arange(0, embed_dim, 2, dtype=jnp.float32)
                  * (-math.log(10000.0) / embed_dim))
    pe = jnp.zeros((num_patches, embed_dim), jnp.float32)
    pe = pe.at[:, 0::2].set(jnp.sin(pos * div))
    pe = pe.at[:, 1::2].set(jnp.cos(pos * div))
    return pe


def init_params(key, patch_size, embed_dim, ff_dim, num_layers):
    keys = jax.random.split(key, 2 + num_layers * 8)
    s = 0.05

    def w(k, shape):
        return s * jax.random.normal(k, shape, jnp.float32)

    embed_p = {"w_T": w(keys[0], (patch_size, embed_dim)),
               "b": w(keys[1], (1, embed_dim))}
    layer_ps = []
    for l in range(num_layers):
        k = keys[2 + 8 * l: 2 + 8 * (l + 1)]
        layer_ps.append({
            "wqkv_T": w(k[0], (embed_dim, 3 * embed_dim)),
            "bqkv": w(k[1], (1, 3 * embed_dim)),
            "wp_T": w(k[2], (embed_dim, embed_dim)),
            "bp": w(k[3], (1, embed_dim)),
            "gamma": jnp.ones((1, embed_dim), jnp.float32),
            "beta": jnp.zeros((1, embed_dim), jnp.float32),
            "w1_T": w(k[4], (embed_dim, ff_dim)),
            "b1": w(k[5], (1, ff_dim)),
            "w2_T": w(k[6], (ff_dim, embed_dim)),
            "b2": w(k[7], (1, embed_dim)),
        })
    return embed_p, layer_ps


def encoder_reference(patches, embed_p, layer_ps, pe, num_heads):
    x = patches @ embed_p["w_T"] + embed_p["b"][0]
    x = x + pe
    for p in layer_ps:
        B, S, E = x.shape
        H = num_heads
        Dh = E // H
        qkv = x @ p["wqkv_T"] + p["bqkv"][0]
        qkv = qkv.reshape(B, S, 3, H, Dh).transpose(0, 2, 3, 1, 4)
        q, k, v = qkv[:, 0], qkv[:, 1], qkv[:, 2]
        sc = jnp.einsum("bhqd,bhkd->bhqk", q, k) / math.sqrt(E)
        a = jax.nn.softmax(sc, axis=-1)
        o = jnp.einsum("bhqk,bhkd->bhqd", a, v)
        o = o.reshape(B, S, E)                      # torch .view semantics
        o = o @ p["wp_T"] + p["bp"][0]
        y = o + x
        mean = y.mean(-1, keepdims=True)
        var = ((y - mean) ** 2).mean(-1, keepdims=True)
        yn = (y - mean) / jnp.sqrt(var + 1e-5) * p["gamma"][0] + p["beta"][0]
        h1 = jnp.maximum(yn @ p["w1_T"] + p["b1"][0], 0.0)
        x = h1 @ p["w2_T"] + p["b2"][0]
    return x


# --------------------------------- main ------------------------------------ #

if __name__ == "__main__":
    # Encoder(embed_dim=32, patch_size=16, num_patches=8, num_layers=2,
    #         num_heads=4, ff_dim=64)
    B, num_patches, patch_size = 2, 8, 16
    embed_dim, num_layers, num_heads, ff_dim = 32, 2, 4, 64

    key = jax.random.PRNGKey(0)
    k_in, k_par = jax.random.split(key)
    patches = jax.random.normal(k_in, (B, num_patches, patch_size), jnp.float32)

    embed_p, layer_ps = init_params(k_par, patch_size, embed_dim, ff_dim, num_layers)
    pe = sinusoidal_pe(num_patches, embed_dim)

    prep = prepare_encoder_params(embed_p, layer_ps, pe, B, num_heads)
    out = jax.block_until_ready(encoder_forward(patches, prep))

    ref = jax.block_until_ready(
        encoder_reference(patches, embed_p, layer_ps, pe, num_heads))

    assert out.shape == (B, num_patches, embed_dim)
    assert jnp.allclose(out, ref, atol=1e-2, rtol=1e-2), \
        f"max abs diff {float(jnp.max(jnp.abs(out - ref)))}"
    print("KERNEL_OK")
</pallas_src>

<mosaic_0001>
module attributes {stable_mosaic.version = 11 : i64} {
  func.func @_encoder_kernel(%arg0: i32, %arg1: memref<16x16xf32, #tpu.memory_space<vmem>>, %arg2: memref<368x128xbf16, #tpu.memory_space<vmem>>, %arg3: memref<128x128xf32, #tpu.memory_space<vmem>>, %arg4: memref<16x32xf32, #tpu.memory_space<vmem>>) attributes {dimension_semantics = [#tpu.dimension_semantics<arbitrary>], iteration_bounds = array<i64: 1>, scalar_prefetch = 0 : i64, scratch_operands = 0 : i64, tpu.core_type = #tpu.core_type<tc>, window_params = [{pipeline_mode = #tpu.pipeline_mode<synchronous>, transform_indices = @transform_0, window_bounds = array<i64: 16, 16>}, {pipeline_mode = #tpu.pipeline_mode<synchronous>, transform_indices = @transform_1, window_bounds = array<i64: 368, 128>}, {pipeline_mode = #tpu.pipeline_mode<synchronous>, transform_indices = @transform_2, window_bounds = array<i64: 128, 128>}, {pipeline_mode = #tpu.pipeline_mode<synchronous>, transform_indices = @transform_3, window_bounds = array<i64: 16, 32>}]} {
    %c0 = arith.constant 0 : index
    %c0_0 = arith.constant 0 : index
    %0 = vector.load %arg1[%c0, %c0_0] : memref<16x16xf32, #tpu.memory_space<vmem>>, vector<16x16xf32>
    %1 = arith.truncf %0 : vector<16x16xf32> to vector<16x16xbf16>
    %c0_1 = arith.constant 0 : index
    %c0_2 = arith.constant 0 : index
    %2 = vector.load %arg2[%c0_1, %c0_2] : memref<368x128xbf16, #tpu.memory_space<vmem>>, vector<16x32xbf16>
    %cst = arith.constant dense<0.000000e+00> : vector<16x32xf32>
    %3 = tpu.matmul %1, %2, %cst {dimension_numbers = #tpu.dot_dimension_numbers<[1], [0], [0], [1], [0, 0, 1, 1], [], []>} : vector<16x16xbf16>, vector<16x32xbf16>, vector<16x32xf32> -> vector<16x32xf32>
    %c0_3 = arith.constant 0 : index
    %c0_4 = arith.constant 0 : index
    %4 = vector.load %arg3[%c0_3, %c0_4] : memref<128x128xf32, #tpu.memory_space<vmem>>, vector<16x32xf32>
    %5 = arith.addf %3, %4 : vector<16x32xf32>
    %c16 = arith.constant 16 : index
    %c0_5 = arith.constant 0 : index
    %6 = vector.load %arg3[%c16, %c0_5] : memref<128x128xf32, #tpu.memory_space<vmem>>, vector<64x64xf32>
    %c16_6 = arith.constant 16 : index
    %c0_7 = arith.constant 0 : index
    %7 = vector.load %arg2[%c16_6, %c0_7] : memref<368x128xbf16, #tpu.memory_space<vmem>>, vector<64x64xbf16>
    %8 = arith.truncf %5 : vector<16x32xf32> to vector<16x32xbf16>
    %c80 = arith.constant 80 : index
    %c0_8 = arith.constant 0 : index
    %9 = vector.load %arg2[%c80, %c0_8] : memref<368x128xbf16, #tpu.memory_space<vmem>>, vector<32x96xbf16>
    %cst_9 = arith.constant dense<0.000000e+00> : vector<16x96xf32>
    %10 = tpu.matmul %8, %9, %cst_9 {dimension_numbers = #tpu.dot_dimension_numbers<[1], [0], [0], [1], [0, 0, 1, 1], [], []>} : vector<16x32xbf16>, vector<32x96xbf16>, vector<16x96xf32> -> vector<16x96xf32>
    %c80_10 = arith.constant 80 : index
    %c0_11 = arith.constant 0 : index
    %11 = vector.load %arg3[%c80_10, %c0_11] : memref<128x128xf32, #tpu.memory_space<vmem>>, vector<1x96xf32>
    %12 = vector.broadcast %11 : vector<1x96xf32> to vector<16x96xf32>
    %13 = arith.addf %10, %12 : vector<16x96xf32>
    %14 = vector.extract_strided_slice %13 {offsets = [0, 0], sizes = [16, 24], strides = [1, 1]} : vector<16x96xf32> to vector<16x24xf32>
    %15 = vector.extract_strided_slice %13 {offsets = [0, 24], sizes = [16, 24], strides = [1, 1]} : vector<16x96xf32> to vector<16x24xf32>
    %16 = vector.extract_strided_slice %13 {offsets = [0, 48], sizes = [16, 24], strides = [1, 1]} : vector<16x96xf32> to vector<16x24xf32>
    %17 = vector.extract_strided_slice %13 {offsets = [0, 72], sizes = [16, 24], strides = [1, 1]} : vector<16x96xf32> to vector<16x24xf32>
    %18 = tpu.concatenate %14, %15, %16, %17 in 0 : vector<16x24xf32>, vector<16x24xf32>, vector<16x24xf32>, vector<16x24xf32> -> vector<64x24xf32>
    %19 = vector.extract_strided_slice %18 {offsets = [0, 0], sizes = [64, 8], strides = [1, 1]} : vector<64x24xf32> to vector<64x8xf32>
    %20 = arith.truncf %19 : vector<64x8xf32> to vector<64x8xbf16>
    %21 = vector.extract_strided_slice %18 {offsets = [0, 8], sizes = [64, 8], strides = [1, 1]} : vector<64x24xf32> to vector<64x8xf32>
    %22 = arith.truncf %21 : vector<64x8xf32> to vector<64x8xbf16>
    %23 = vector.extract_strided_slice %18 {offsets = [0, 16], sizes = [64, 8], strides = [1, 1]} : vector<64x24xf32> to vector<64x8xf32>
    %24 = arith.truncf %23 : vector<64x8xf32> to vector<64x8xbf16>
    %cst_12 = arith.constant dense<0.000000e+00> : vector<64x64xf32>
    %25 = tpu.matmul %20, %22, %cst_12 {dimension_numbers = #tpu.dot_dimension_numbers<[1], [1], [0], [0], [0, 0, 1, 0], [], []>} : vector<64x8xbf16>, vector<64x8xbf16>, vector<64x64xf32> -> vector<64x64xf32>
    %cst_13 = arith.constant 0.176776692 : f32
    %26 = vector.broadcast %cst_13 : f32 to vector<64x64xf32>
    %27 = arith.mulf %25, %26 : vector<64x64xf32>
    %28 = arith.addf %27, %6 : vector<64x64xf32>
    %cst_14 = arith.constant dense<0xFF800000> : vector<64xf32>
    %29 = vector.multi_reduction <maximumf>, %28, %cst_14 [1] : vector<64x64xf32> to vector<64xf32>
    %30 = vector.shape_cast %29 : vector<64xf32> to vector<64x1xf32>
    %31 = vector.broadcast %30 : vector<64x1xf32> to vector<64x64xf32>
    %32 = arith.subf %28, %31 : vector<64x64xf32>
    %33 = math.exp %32 : vector<64x64xf32>
    %cst_15 = arith.constant dense<0.000000e+00> : vector<64xf32>
    %34 = vector.multi_reduction <add>, %33, %cst_15 [1] : vector<64x64xf32> to vector<64xf32>
    %35 = vector.shape_cast %34 : vector<64xf32> to vector<64x1xf32>
    %36 = tpu.reciprocal %35 {approx = true} : vector<64x1xf32> -> vector<64x1xf32>
    %37 = vector.broadcast %36 : vector<64x1xf32> to vector<64x64xf32>
    %38 = arith.mulf %33, %37 : vector<64x64xf32>
    %39 = arith.truncf %38 : vector<64x64xf32> to vector<64x64xbf16>
    %cst_16 = arith.constant dense<0.000000e+00> : vector<64x8xf32>
    %40 = tpu.matmul %39, %24, %cst_16 {dimension_numbers = #tpu.dot_dimension_numbers<[1], [0], [0], [1], [0, 0, 1, 1], [], []>} : vector<64x64xbf16>, vector<64x8xbf16>, vector<64x8xf32> -> vector<64x8xf32>
    %41 = arith.truncf %40 : vector<64x8xf32> to vector<64x8xbf16>
    %c112 = arith.constant 112 : index
    %c0_17 = arith.constant 0 : index
    %42 = vector.load %arg2[%c112, %c0_17] : memref<368x128xbf16, #tpu.memory_space<vmem>>, vector<8x128xbf16>
    %cst_18 = arith.constant dense<0.000000e+00> : vector<64x128xf32>
    %43 = tpu.matmul %41, %42, %cst_18 {dimension_numbers = #tpu.dot_dimension_numbers<[1], [0], [0], [1], [0, 0, 1, 1], [], []>} : vector<64x8xbf16>, vector<8x128xbf16>, vector<64x128xf32> -> vector<64x128xf32>
    %c88 = arith.constant 88 : index
    %c0_19 = arith.constant 0 : index
    %44 = vector.load %arg3[%c88, %c0_19] : memref<128x128xf32, #tpu.memory_space<vmem>>, vector<4x32xf32>
    %45 = vector.extract_strided_slice %44 {offsets = [0, 0], sizes = [1, 32], strides = [1, 1]} : vector<4x32xf32> to vector<1x32xf32>
    %46 = vector.extract_strided_slice %7 {offsets = [0, 0], sizes = [16, 64], strides = [1, 1]} : vector<64x64xbf16> to vector<16x64xbf16>
    %47 = vector.extract_strided_slice %43 {offsets = [0, 0], sizes = [64, 32], strides = [1, 1]} : vector<64x128xf32> to vector<64x32xf32>
    %48 = arith.truncf %47 : vector<64x32xf32> to vector<64x32xbf16>
    %cst_20 = arith.constant dense<0.000000e+00> : vector<16x32xf32>
    %49 = tpu.matmul %46, %48, %cst_20 {dimension_numbers = #tpu.dot_dimension_numbers<[1], [0], [0], [1], [0, 0, 1, 1], [], []>} : vector<16x64xbf16>, vector<64x32xbf16>, vector<16x32xf32> -> vector<16x32xf32>
    %50 = vector.broadcast %45 : vector<1x32xf32> to vector<16x32xf32>
    %51 = arith.addf %50, %49 : vector<16x32xf32>
    %52 = vector.extract_strided_slice %7 {offsets = [16, 0], sizes = [16, 64], strides = [1, 1]} : vector<64x64xbf16> to vector<16x64xbf16>
    %53 = vector.extract_strided_slice %43 {offsets = [0, 32], sizes = [64, 32], strides = [1, 1]} : vector<64x128xf32> to vector<64x32xf32>
    %54 = arith.truncf %53 : vector<64x32xf32> to vector<64x32xbf16>
    %cst_21 = arith.constant dense<0.000000e+00> : vector<16x32xf32>
    %55 = tpu.matmul %52, %54, %cst_21 {dimension_numbers = #tpu.dot_dimension_numbers<[1], [0], [0], [1], [0, 0, 1, 1], [], []>} : vector<16x64xbf16>, vector<64x32xbf16>, vector<16x32xf32> -> vector<16x32xf32>
    %56 = arith.addf %51, %55 : vector<16x32xf32>
    %57 = vector.extract_strided_slice %7 {offsets = [32, 0], sizes = [16, 64], strides = [1, 1]} : vector<64x64xbf16> to vector<16x64xbf16>
    %58 = vector.extract_strided_slice %43 {offsets = [0, 64], sizes = [64, 32], strides = [1, 1]} : vector<64x128xf32> to vector<64x32xf32>
    %59 = arith.truncf %58 : vector<64x32xf32> to vector<64x32xbf16>
    %cst_22 = arith.constant dense<0.000000e+00> : vector<16x32xf32>
    %60 = tpu.matmul %57, %59, %cst_22 {dimension_numbers = #tpu.dot_dimension_numbers<[1], [0], [0], [1], [0, 0, 1, 1], [], []>} : vector<16x64xbf16>, vector<64x32xbf16>, vector<16x32xf32> -> vector<16x32xf32>
    %61 = arith.addf %56, %60 : vector<16x32xf32>
    %62 = vector.extract_strided_slice %7 {offsets = [48, 0], sizes = [16, 64], strides = [1, 1]} : vector<64x64xbf16> to vector<16x64xbf16>
    %63 = vector.extract_strided_slice %43 {offsets = [0, 96], sizes = [64, 32], strides = [1, 1]} : vector<64x128xf32> to vector<64x32xf32>
    %64 = arith.truncf %63 : vector<64x32xf32> to vector<64x32xbf16>
    %cst_23 = arith.constant dense<0.000000e+00> : vector<16x32xf32>
    %65 = tpu.matmul %62, %64, %cst_23 {dimension_numbers = #tpu.dot_dimension_numbers<[1], [0], [0], [1], [0, 0, 1, 1], [], []>} : vector<16x64xbf16>, vector<64x32xbf16>, vector<16x32xf32> -> vector<16x32xf32>
    %66 = arith.addf %61, %65 : vector<16x32xf32>
    %67 = arith.addf %66, %5 : vector<16x32xf32>
    %cst_24 = arith.constant dense<0.000000e+00> : vector<16xf32>
    %68 = vector.multi_reduction <add>, %67, %cst_24 [1] : vector<16x32xf32> to vector<16xf32>
    %69 = vector.shape_cast %68 : vector<16xf32> to vector<16x1xf32>
    %cst_25 = arith.constant 3.200000e+01 : f32
    %70 = vector.broadcast %cst_25 : f32 to vector<16x1xf32>
    %71 = arith.divf %69, %70 : vector<16x1xf32>
    %72 = vector.broadcast %71 : vector<16x1xf32> to vector<16x32xf32>
    %73 = arith.subf %67, %72 : vector<16x32xf32>
    %74 = arith.mulf %73, %73 : vector<16x32xf32>
    %cst_26 = arith.constant dense<0.000000e+00> : vector<16xf32>
    %75 = vector.multi_reduction <add>, %74, %cst_26 [1] : vector<16x32xf32> to vector<16xf32>
    %76 = vector.shape_cast %75 : vector<16xf32> to vector<16x1xf32>
    %cst_27 = arith.constant 3.200000e+01 : f32
    %77 = vector.broadcast %cst_27 : f32 to vector<16x1xf32>
    %78 = arith.divf %76, %77 : vector<16x1xf32>
    %79 = vector.broadcast %71 : vector<16x1xf32> to vector<16x32xf32>
    %80 = arith.subf %67, %79 : vector<16x32xf32>
    %cst_28 = arith.constant 9.99999974E-6 : f32
    %81 = vector.broadcast %cst_28 : f32 to vector<16x1xf32>
    %82 = arith.addf %78, %81 : vector<16x1xf32>
    %83 = math.rsqrt %82 : vector<16x1xf32>
    %84 = vector.broadcast %83 : vector<16x1xf32> to vector<16x32xf32>
    %85 = arith.mulf %80, %84 : vector<16x32xf32>
    %86 = vector.extract_strided_slice %44 {offsets = [1, 0], sizes = [1, 32], strides = [1, 1]} : vector<4x32xf32> to vector<1x32xf32>
    %87 = vector.broadcast %86 : vector<1x32xf32> to vector<16x32xf32>
    %88 = arith.mulf %85, %87 : vector<16x32xf32>
    %89 = vector.extract_strided_slice %44 {offsets = [2, 0], sizes = [1, 32], strides = [1, 1]} : vector<4x32xf32> to vector<1x32xf32>
    %90 = vector.broadcast %89 : vector<1x32xf32> to vector<16x32xf32>
    %91 = arith.addf %88, %90 : vector<16x32xf32>
    %92 = arith.truncf %91 : vector<16x32xf32> to vector<16x32xbf16>
    %c128 = arith.constant 128 : index
    %c0_29 = arith.constant 0 : index
    %93 = vector.load %arg2[%c128, %c0_29] : memref<368x128xbf16, #tpu.memory_space<vmem>>, vector<32x64xbf16>
    %cst_30 = arith.constant dense<0.000000e+00> : vector<16x64xf32>
    %94 = tpu.matmul %92, %93, %cst_30 {dimension_numbers = #tpu.dot_dimension_numbers<[1], [0], [0], [1], [0, 0, 1, 1], [], []>} : vector<16x32xbf16>, vector<32x64xbf16>, vector<16x64xf32> -> vector<16x64xf32>
    %c96 = arith.constant 96 : index
    %c0_31 = arith.constant 0 : index
    %95 = vector.load %arg3[%c96, %c0_31] : memref<128x128xf32, #tpu.memory_space<vmem>>, vector<1x64xf32>
    %96 = vector.broadcast %95 : vector<1x64xf32> to vector<16x64xf32>
    %97 = arith.addf %94, %96 : vector<16x64xf32>
    %cst_32 = arith.constant 0.000000e+00 : f32
    %98 = vector.broadcast %cst_32 : f32 to vector<16x64xf32>
    %99 = arith.maximumf %97, %98 : vector<16x64xf32>
    %100 = arith.truncf %99 : vector<16x64xf32> to vector<16x64xbf16>
    %c160 = arith.constant 160 : index
    %c0_33 = arith.constant 0 : index
    %101 = vector.load %arg2[%c160, %c0_33] : memref<368x128xbf16, #tpu.memory_space<vmem>>, vector<64x32xbf16>
    %cst_34 = arith.constant dense<0.000000e+00> : vector<16x32xf32>
    %102 = tpu.matmul %100, %101, %cst_34 {dimension_numbers = #tpu.dot_dimension_numbers<[1], [0], [0], [1], [0, 0, 1, 1], [], []>} : vector<16x64xbf16>, vector<64x32xbf16>, vector<16x32xf32> -> vector<16x32xf32>
    %103 = vector.extract_strided_slice %44 {offsets = [3, 0], sizes = [1, 32], strides = [1, 1]} : vector<4x32xf32> to vector<1x32xf32>
    %104 = vector.broadcast %103 : vector<1x32xf32> to vector<16x32xf32>
    %105 = arith.addf %102, %104 : vector<16x32xf32>
    %106 = arith.truncf %105 : vector<16x32xf32> to vector<16x32xbf16>
    %c224 = arith.constant 224 : index
    %c0_35 = arith.constant 0 : index
    %107 = vector.load %arg2[%c224, %c0_35] : memref<368x128xbf16, #tpu.memory_space<vmem>>, vector<32x96xbf16>
    %cst_36 = arith.constant dense<0.000000e+00> : vector<16x96xf32>
    %108 = tpu.matmul %106, %107, %cst_36 {dimension_numbers = #tpu.dot_dimension_numbers<[1], [0], [0], [1], [0, 0, 1, 1], [], []>} : vector<16x32xbf16>, vector<32x96xbf16>, vector<16x96xf32> -> vector<16x96xf32>
    %c104 = arith.constant 104 : index
    %c0_37 = arith.constant 0 : index
    %109 = vector.load %arg3[%c104, %c0_37] : memref<128x128xf32, #tpu.memory_space<vmem>>, vector<1x96xf32>
    %110 = vector.broadcast %109 : vector<1x96xf32> to vector<16x96xf32>
    %111 = arith.addf %108, %110 : vector<16x96xf32>
    %112 = vector.extract_strided_slice %111 {offsets = [0, 0], sizes = [16, 24], strides = [1, 1]} : vector<16x96xf32> to vector<16x24xf32>
    %113 = vector.extract_strided_slice %111 {offsets = [0, 24], sizes = [16, 24], strides = [1, 1]} : vector<16x96xf32> to vector<16x24xf32>
    %114 = vector.extract_strided_slice %111 {offsets = [0, 48], sizes = [16, 24], strides = [1, 1]} : vector<16x96xf32> to vector<16x24xf32>
    %115 = vector.extract_strided_slice %111 {offsets = [0, 72], sizes = [16, 24], strides = [1, 1]} : vector<16x96xf32> to vector<16x24xf32>
    %116 = tpu.concatenate %112, %113, %114, %115 in 0 : vector<16x24xf32>, vector<16x24xf32>, vector<16x24xf32>, vector<16x24xf32> -> vector<64x24xf32>
    %117 = vector.extract_strided_slice %116 {offsets = [0, 0], sizes = [64, 8], strides = [1, 1]} : vector<64x24xf32> to vector<64x8xf32>
    %118 = arith.truncf %117 : vector<64x8xf32> to vector<64x8xbf16>
    %119 = vector.extract_strided_slice %116 {offsets = [0, 8], sizes = [64, 8], strides = [1, 1]} : vector<64x24xf32> to vector<64x8xf32>
    %120 = arith.truncf %119 : vector<64x8xf32> to vector<64x8xbf16>
    %121 = vector.extract_strided_slice %116 {offsets = [0, 16], sizes = [64, 8], strides = [1, 1]} : vector<64x24xf32> to vector<64x8xf32>
    %122 = arith.truncf %121 : vector<64x8xf32> to vector<64x8xbf16>
    %cst_38 = arith.constant dense<0.000000e+00> : vector<64x64xf32>
    %123 = tpu.matmul %118, %120, %cst_38 {dimension_numbers = #tpu.dot_dimension_numbers<[1], [1], [0], [0], [0, 0, 1, 0], [], []>} : vector<64x8xbf16>, vector<64x8xbf16>, vector<64x64xf32> -> vector<64x64xf32>
    %cst_39 = arith.constant 0.176776692 : f32
    %124 = vector.broadcast %cst_39 : f32 to vector<64x64xf32>
    %125 = arith.mulf %123, %124 : vector<64x64xf32>
    %126 = arith.addf %125, %6 : vector<64x64xf32>
    %cst_40 = arith.constant dense<0xFF800000> : vector<64xf32>
    %127 = vector.multi_reduction <maximumf>, %126, %cst_40 [1] : vector<64x64xf32> to vector<64xf32>
    %128 = vector.shape_cast %127 : vector<64xf32> to vector<64x1xf32>
    %129 = vector.broadcast %128 : vector<64x1xf32> to vector<64x64xf32>
    %130 = arith.subf %126, %129 : vector<64x64xf32>
    %131 = math.exp %130 : vector<64x64xf32>
    %cst_41 = arith.constant dense<0.000000e+00> : vector<64xf32>
    %132 = vector.multi_reduction <add>, %131, %cst_41 [1] : vector<64x64xf32> to vector<64xf32>
    %133 = vector.shape_cast %132 : vector<64xf32> to vector<64x1xf32>
    %134 = tpu.reciprocal %133 {approx = true} : vector<64x1xf32> -> vector<64x1xf32>
    %135 = vector.broadcast %134 : vector<64x1xf32> to vector<64x64xf32>
    %136 = arith.mulf %131, %135 : vector<64x64xf32>
    %137 = arith.truncf %136 : vector<64x64xf32> to vector<64x64xbf16>
    %cst_42 = arith.constant dense<0.000000e+00> : vector<64x8xf32>
    %138 = tpu.matmul %137, %122, %cst_42 {dimension_numbers = #tpu.dot_dimension_numbers<[1], [0], [0], [1], [0, 0, 1, 1], [], []>} : vector<64x64xbf16>, vector<64x8xbf16>, vector<64x8xf32> -> vector<64x8xf32>
    %139 = arith.truncf %138 : vector<64x8xf32> to vector<64x8xbf16>
    %c256 = arith.constant 256 : index
    %c0_43 = arith.constant 0 : index
    %140 = vector.load %arg2[%c256, %c0_43] : memref<368x128xbf16, #tpu.memory_space<vmem>>, vector<8x128xbf16>
    %cst_44 = arith.constant dense<0.000000e+00> : vector<64x128xf32>
    %141 = tpu.matmul %139, %140, %cst_44 {dimension_numbers = #tpu.dot_dimension_numbers<[1], [0], [0], [1], [0, 0, 1, 1], [], []>} : vector<64x8xbf16>, vector<8x128xbf16>, vector<64x128xf32> -> vector<64x128xf32>
    %c112_45 = arith.constant 112 : index
    %c0_46 = arith.constant 0 : index
    %142 = vector.load %arg3[%c112_45, %c0_46] : memref<128x128xf32, #tpu.memory_space<vmem>>, vector<4x32xf32>
    %143 = vector.extract_strided_slice %142 {offsets = [0, 0], sizes = [1, 32], strides = [1, 1]} : vector<4x32xf32> to vector<1x32xf32>
    %144 = vector.extract_strided_slice %7 {offsets = [0, 0], sizes = [16, 64], strides = [1, 1]} : vector<64x64xbf16> to vector<16x64xbf16>
    %145 = vector.extract_strided_slice %141 {offsets = [0, 0], sizes = [64, 32], strides = [1, 1]} : vector<64x128xf32> to vector<64x32xf32>
    %146 = arith.truncf %145 : vector<64x32xf32> to vector<64x32xbf16>
    %cst_47 = arith.constant dense<0.000000e+00> : vector<16x32xf32>
    %147 = tpu.matmul %144, %146, %cst_47 {dimension_numbers = #tpu.dot_dimension_numbers<[1], [0], [0], [1], [0, 0, 1, 1], [], []>} : vector<16x64xbf16>, vector<64x32xbf16>, vector<16x32xf32> -> vector<16x32xf32>
    %148 = vector.broadcast %143 : vector<1x32xf32> to vector<16x32xf32>
    %149 = arith.addf %148, %147 : vector<16x32xf32>
    %150 = vector.extract_strided_slice %7 {offsets = [16, 0], sizes = [16, 64], strides = [1, 1]} : vector<64x64xbf16> to vector<16x64xbf16>
    %151 = vector.extract_strided_slice %141 {offsets = [0, 32], sizes = [64, 32], strides = [1, 1]} : vector<64x128xf32> to vector<64x32xf32>
    %152 = arith.truncf %151 : vector<64x32xf32> to vector<64x32xbf16>
    %cst_48 = arith.constant dense<0.000000e+00> : vector<16x32xf32>
    %153 = tpu.matmul %150, %152, %cst_48 {dimension_numbers = #tpu.dot_dimension_numbers<[1], [0], [0], [1], [0, 0, 1, 1], [], []>} : vector<16x64xbf16>, vector<64x32xbf16>, vector<16x32xf32> -> vector<16x32xf32>
    %154 = arith.addf %149, %153 : vector<16x32xf32>
    %155 = vector.extract_strided_slice %7 {offsets = [32, 0], sizes = [16, 64], strides = [1, 1]} : vector<64x64xbf16> to vector<16x64xbf16>
    %156 = vector.extract_strided_slice %141 {offsets = [0, 64], sizes = [64, 32], strides = [1, 1]} : vector<64x128xf32> to vector<64x32xf32>
    %157 = arith.truncf %156 : vector<64x32xf32> to vector<64x32xbf16>
    %cst_49 = arith.constant dense<0.000000e+00> : vector<16x32xf32>
    %158 = tpu.matmul %155, %157, %cst_49 {dimension_numbers = #tpu.dot_dimension_numbers<[1], [0], [0], [1], [0, 0, 1, 1], [], []>} : vector<16x64xbf16>, vector<64x32xbf16>, vector<16x32xf32> -> vector<16x32xf32>
    %159 = arith.addf %154, %158 : vector<16x32xf32>
    %160 = vector.extract_strided_slice %7 {offsets = [48, 0], sizes = [16, 64], strides = [1, 1]} : vector<64x64xbf16> to vector<16x64xbf16>
    %161 = vector.extract_strided_slice %141 {offsets = [0, 96], sizes = [64, 32], strides = [1, 1]} : vector<64x128xf32> to vector<64x32xf32>
    %162 = arith.truncf %161 : vector<64x32xf32> to vector<64x32xbf16>
    %cst_50 = arith.constant dense<0.000000e+00> : vector<16x32xf32>
    %163 = tpu.matmul %160, %162, %cst_50 {dimension_numbers = #tpu.dot_dimension_numbers<[1], [0], [0], [1], [0, 0, 1, 1], [], []>} : vector<16x64xbf16>, vector<64x32xbf16>, vector<16x32xf32> -> vector<16x32xf32>
    %164 = arith.addf %159, %163 : vector<16x32xf32>
    %165 = arith.addf %164, %105 : vector<16x32xf32>
    %cst_51 = arith.constant dense<0.000000e+00> : vector<16xf32>
    %166 = vector.multi_reduction <add>, %165, %cst_51 [1] : vector<16x32xf32> to vector<16xf32>
    %167 = vector.shape_cast %166 : vector<16xf32> to vector<16x1xf32>
    %cst_52 = arith.constant 3.200000e+01 : f32
    %168 = vector.broadcast %cst_52 : f32 to vector<16x1xf32>
    %169 = arith.divf %167, %168 : vector<16x1xf32>
    %170 = vector.broadcast %169 : vector<16x1xf32> to vector<16x32xf32>
    %171 = arith.subf %165, %170 : vector<16x32xf32>
    %172 = arith.mulf %171, %171 : vector<16x32xf32>
    %cst_53 = arith.constant dense<0.000000e+00> : vector<16xf32>
    %173 = vector.multi_reduction <add>, %172, %cst_53 [1] : vector<16x32xf32> to vector<16xf32>
    %174 = vector.shape_cast %173 : vector<16xf32> to vector<16x1xf32>
    %cst_54 = arith.constant 3.200000e+01 : f32
    %175 = vector.broadcast %cst_54 : f32 to vector<16x1xf32>
    %176 = arith.divf %174, %175 : vector<16x1xf32>
    %177 = vector.broadcast %169 : vector<16x1xf32> to vector<16x32xf32>
    %178 = arith.subf %165, %177 : vector<16x32xf32>
    %cst_55 = arith.constant 9.99999974E-6 : f32
    %179 = vector.broadcast %cst_55 : f32 to vector<16x1xf32>
    %180 = arith.addf %176, %179 : vector<16x1xf32>
    %181 = math.rsqrt %180 : vector<16x1xf32>
    %182 = vector.broadcast %181 : vector<16x1xf32> to vector<16x32xf32>
    %183 = arith.mulf %178, %182 : vector<16x32xf32>
    %184 = vector.extract_strided_slice %142 {offsets = [1, 0], sizes = [1, 32], strides = [1, 1]} : vector<4x32xf32> to vector<1x32xf32>
    %185 = vector.broadcast %184 : vector<1x32xf32> to vector<16x32xf32>
    %186 = arith.mulf %183, %185 : vector<16x32xf32>
    %187 = vector.extract_strided_slice %142 {offsets = [2, 0], sizes = [1, 32], strides = [1, 1]} : vector<4x32xf32> to vector<1x32xf32>
    %188 = vector.broadcast %187 : vector<1x32xf32> to vector<16x32xf32>
    %189 = arith.addf %186, %188 : vector<16x32xf32>
    %190 = arith.truncf %189 : vector<16x32xf32> to vector<16x32xbf16>
    %c272 = arith.constant 272 : index
    %c0_56 = arith.constant 0 : index
    %191 = vector.load %arg2[%c272, %c0_56] : memref<368x128xbf16, #tpu.memory_space<vmem>>, vector<32x64xbf16>
    %cst_57 = arith.constant dense<0.000000e+00> : vector<16x64xf32>
    %192 = tpu.matmul %190, %191, %cst_57 {dimension_numbers = #tpu.dot_dimension_numbers<[1], [0], [0], [1], [0, 0, 1, 1], [], []>} : vector<16x32xbf16>, vector<32x64xbf16>, vector<16x64xf32> -> vector<16x64xf32>
    %c120 = arith.constant 120 : index
    %c0_58 = arith.constant 0 : index
    %193 = vector.load %arg3[%c120, %c0_58] : memref<128x128xf32, #tpu.memory_space<vmem>>, vector<1x64xf32>
    %194 = vector.broadcast %193 : vector<1x64xf32> to vector<16x64xf32>
    %195 = arith.addf %192, %194 : vector<16x64xf32>
    %cst_59 = arith.constant 0.000000e+00 : f32
    %196 = vector.broadcast %cst_59 : f32 to vector<16x64xf32>
    %197 = arith.maximumf %195, %196 : vector<16x64xf32>
    %198 = arith.truncf %197 : vector<16x64xf32> to vector<16x64xbf16>
    %c304 = arith.constant 304 : index
    %c0_60 = arith.constant 0 : index
    %199 = vector.load %arg2[%c304, %c0_60] : memref<368x128xbf16, #tpu.memory_space<vmem>>, vector<64x32xbf16>
    %cst_61 = arith.constant dense<0.000000e+00> : vector<16x32xf32>
    %200 = tpu.matmul %198, %199, %cst_61 {dimension_numbers = #tpu.dot_dimension_numbers<[1], [0], [0], [1], [0, 0, 1, 1], [], []>} : vector<16x64xbf16>, vector<64x32xbf16>, vector<16x32xf32> -> vector<16x32xf32>
    %201 = vector.extract_strided_slice %142 {offsets = [3, 0], sizes = [1, 32], strides = [1, 1]} : vector<4x32xf32> to vector<1x32xf32>
    %202 = vector.broadcast %201 : vector<1x32xf32> to vector<16x32xf32>
    %203 = arith.addf %200, %202 : vector<16x32xf32>
    %c0_62 = arith.constant 0 : index
    %c0_63 = arith.constant 0 : index
    %204 = vector.load %arg4[%c0_62, %c0_63] : memref<16x32xf32, #tpu.memory_space<vmem>>, vector<16x32xf32>
    tpu.vector_store %arg4[%c0_62, %c0_63], %203 {strides = array<i32>} : memref<16x32xf32, #tpu.memory_space<vmem>>, vector<16x32xf32>,
    return
  }
  func.func @transform_0(%arg0: i32) -> (i32, i32) {
    %c0_i32 = arith.constant 0 : i32
    %c0_i32_0 = arith.constant 0 : i32
    %c0_i32_1 = arith.constant 0 : i32
    return %c0_i32, %c0_i32_0 : i32, i32
  }
  func.func @transform_1(%arg0: i32) -> (i32, i32) {
    %c0_i32 = arith.constant 0 : i32
    %c0_i32_0 = arith.constant 0 : i32
    %c0_i32_1 = arith.constant 0 : i32
    return %c0_i32, %c0_i32_0 : i32, i32
  }
  func.func @transform_2(%arg0: i32) -> (i32, i32) {
    %c0_i32 = arith.constant 0 : i32
    %c0_i32_0 = arith.constant 0 : i32
    %c0_i32_1 = arith.constant 0 : i32
    return %c0_i32, %c0_i32_0 : i32, i32
  }
  func.func @transform_3(%arg0: i32) -> (i32, i32) {
    %c0_i32 = arith.constant 0 : i32
    %c0_i32_0 = arith.constant 0 : i32
    %c0_i32_1 = arith.constant 0 : i32
    return %c0_i32, %c0_i32_0 : i32, i32
  }
}

</mosaic_0001>

<bundles_post_ra>
// kernel: tpu_custom_call.1
= control target key start
LH: loop header
LB: loop body
LE: loop exit
PB: predicated region body
PF: predicated region fallthrough
CT: control target
= control target key end

     0   :  { %8 = vsyncpa [#allocation3], 0  ;;  %s3037_s0 = inlined_call_operand.hbm [shape: f32[16,16], index: 0, kind: input, shape index: {}]   ;;  %s3038_s1 = inlined_call_operand.hbm [shape: bf16[368,128], index: 1, kind: input, shape index: {}]   ;;  %s3039_s2 = inlined_call_operand.hbm [shape: f32[128,128], index: 2, kind: input, shape index: {}]   ;;  %s3040_s3 = inlined_call_operand.hbm [shape: f32[16,32], index: 3, kind: output, shape index: {}]  }
   0x1   :  { %9 = vsyncpa [#allocation6], 0 }
   0x2   :  { %10 = vsyncpa [#allocation4], 0  ;;  %s2602_s12 = smov [#allocation5]  }
   0x3   :  { %s28_s13 = sshll.u32 %s2602_s12, 4  ;;  %s29_s13 = int_to_ptr.vmem [resolvable:$true] %s28_s13 }
   0x4   :  { %s2524_s14 = scalar_lea.vmem %s29_s13, 2944  ;;  %p2529_p1 = scmp.lt.s32.totalorder %s29_s13, %s29_s13 }
   0x5   :  { %p2525_p0 = scmp.ne.s32.totalorder %s29_s13, %s2524_s14  ;;  %p2530_p2 = scmp.lt.s32.totalorder %s2524_s14, %s2524_s14 }
   0x7   :  { %p2531_p3 = por %p2530_p2, %p2529_p1 }
   0x9   :  { %p2532_p4 = pnand %p2531_p3, %p2525_p0 }
   0xb   :  { %2535 = shalt.err (!%p2532_p4)
}
   0xc   :  { %s2603_s15 = smov 64   ;;  %s2604_s16 = smov 4  }
   0xd   :  { %34 = dma.hbm_to_vmem [thread:$0]  %s3038_s1, 2944, %s29_s13, [#allocation6], %s2603_s15, %s2603_s15, %s2604_s16  }
   0xe   :  { %s2605_s19 = smov [#allocation2]  }
   0xf   :  { %s16_s20 = sshll.u32 %s2605_s19, 4  ;;  %s17_s20 = int_to_ptr.vmem [resolvable:$true] %s16_s20 }
  0x10   :  { %s2544_s21 = scalar_lea.vmem %s17_s20, 256  ;;  %p2549_p6 = scmp.lt.s32.totalorder %s17_s20, %s17_s20 }
  0x11   :  { %p2545_p5 = scmp.ne.s32.totalorder %s17_s20, %s2544_s21  ;;  %p2550_p7 = scmp.lt.s32.totalorder %s2544_s21, %s2544_s21 }
  0x13   :  { %p2551_p8 = por %p2550_p7, %p2549_p6 }
  0x15   :  { %p2552_p9 = pnand %p2551_p8, %p2545_p5 }
  0x17   :  { %2555 = shalt.err (!%p2552_p9)
}
  0x18   :  { %s2606_s22 = smov 128   ;;  %s2607_s23 = smov 8  }
  0x19   :  { %22 = dma.hbm_to_vmem [thread:$0]  %s3037_s0, 256, %s17_s20, [#allocation3], %s2606_s22, %s2606_s22, %s2607_s23  }
  0x1a   :  { %s2608_s1 = smov [#allocation7]  }
  0x1b   :  { %s40_s26 = sshll.u32 %s2608_s1, 4  ;;  %s41_s26 = int_to_ptr.vmem [resolvable:$true] %s40_s26 }
  0x1c   :  { %s2564_s27 = scalar_lea.vmem %s41_s26, 2048  ;;  %p2569_p11 = scmp.lt.s32.totalorder %s41_s26, %s41_s26 }
  0x1d   :  { %p2565_p10 = scmp.ne.s32.totalorder %s41_s26, %s2564_s27  ;;  %p2570_p12 = scmp.lt.s32.totalorder %s2564_s27, %s2564_s27 }
  0x1f   :  { %p2571_p13 = por %p2570_p12, %p2569_p11 }
  0x21   :  { %p2572_p0 = pnand %p2571_p13, %p2565_p10 }
  0x23   :  { %2575 = shalt.err (!%p2572_p0)
}
  0x24   :  { %46 = dma.hbm_to_vmem [thread:$0]  %s3039_s2, 2048, %s41_s26, [#allocation6], %s2606_s22, %s2606_s22, %s2607_s23  }
  0x25   :  { %2596 = dma.done.wait [#allocation3], 256  }
  0x26   :  { %2597 = vsyncadd [#allocation3], 4294967040 }
  0x27   :  { %2598 = dma.done.wait [#allocation6], 4992  }
  0x28   :  { %2599 = vsyncadd [#allocation6], 4294962304  ;;  %v2609_v0 = vmov 0.0   ;;  %vm2610_vm0 = vmmov 0   ;;  %v2423_v1 = vld [vmem:[#allocation5] sm:$0xff]   ;;  %v57_v2 = vld [vmem:[#allocation2] sm:$0xff] }
  0x29   :  { %2124 = vmatprep.subr.bf16.mxu0 %v2609_v0  ;;  %2126 = vmatprep.mubr.msk.bf16.mxu0 %vm2610_vm0, %v2609_v0  ;;  %v58_v3 = vld [vmem:[#allocation2 + $0x8] sm:$0xff]  ;;  %vm70_vm1 = vcmask 130048   ;;  %v2424_v5 = vld [vmem:[#allocation5 + $0x30] sm:$0xff]   ;;  %v2425_v6 = vld [vmem:[#allocation5 + $0x28] sm:$0xff]   ;;  %vm153_vm2 = vcmask 261120   ;;  %vm234_vm3 = vcmask 64512  }
  0x2a   :  { %2125 = vmatpush3.bf16.msra.mxu0 %v2423_v1  ;;  %v59_v4 = vpack.c.bf16 %v58_v3, %v57_v2  ;;  %v62_v8 = vld [vmem:[#allocation7] sm:$0xff]  ;;  %v63_v10 = vld [vmem:[#allocation7 + $0x8] sm:$0xff]  ;;  %v1956_v17 = vld [vmem:[#allocation7 + $0x50] ss:$0 sm:$0xff]  ;;  %s2611_s0 = smov 104   ;;  %s2612_s2 = smov 56  }
  0x2b   :  { %2130 = vmatprep.subr.bf16.mxu0 %v2609_v0  ;;  %s2613_s30 = smov 80   ;;  %s2614_s4 = smov 120   ;;  %v2708_v47 = vld [vmem:[#allocation7 + $0x10] sm:$0xff]  ;;  %v2710_v50 = vld [vmem:[#allocation7 + $0x28] sm:$0xff]  ;;  %vm340_vm4 = vcmask 523264   ;;  %v2713_v55 = vld [vmem:[#allocation7 + $0x18] sm:$0xff] }
  0x2c   :  { %v2717_v59 = vld [vmem:[#allocation7 + $0x20] sm:$0xff]  ;;  %s2615_s5 = smov 112   ;;  %vm539_vm5 = vcmask 1043456   ;;  %s2616_s6 = smov 96  }
  0x2d   :  { %2127 = vmatmul.mubr.msk.bf16.vlgmr.msra.gmra.mxu0 %vm70_vm1, %v59_v4  ;;  %s2617_s7 = smov 32   ;;  %s2618_s8 = smov [#allocation8]  }
  0x2e   :  { %2134 = vmatprep.mubr.msk.bf16.mxu0 %vm2610_vm0, %v2609_v0  ;;  %2131 = vmatpush3.bf16.msra.mxu0 %v2424_v5  ;;  %v2723_v5 = vld [vmem:[#allocation7 + $0x30] sm:$0xff]  ;;  %s1941_s9 = sshll.u32 %s2618_s8, 4  ;;  %s1942_s9 = int_to_ptr.vmem [resolvable:$true] %s1941_s9 }
  0x2f   :  { %2132 = vmatprep.subr.bf16.mxu0 %v2609_v0  ;;  %s2576_s10 = scalar_lea.vmem %s1942_s9, 256  ;;  %p2581_p2 = scmp.lt.s32.totalorder %s1942_s9, %s1942_s9 }
  0x30   :  { %p2577_p1 = scmp.ne.s32.totalorder %s1942_s9, %s2576_s10  ;;  %p2582_p3 = scmp.lt.s32.totalorder %s2576_s10, %s2576_s10 }
  0x32   :  { %2133 = vmatpush3.bf16.msra.mxu0 %v2425_v6  ;;  %p2583_p4 = por %p2582_p3, %p2581_p2 }
  0x34   :  { %p2584_p5 = pnand %p2583_p4, %p2577_p1 }
  0xed   :  { %v108_v7 = vpop.f32.mrf.mxu0 }
  0xee   :  { %v2663_v12 = vadd.f32 %v108_v7, %v62_v8  ;;  %v2726_v8 = vld [vmem:[#allocation7 + $0x38] sm:$0xff] }
  0xef   :  { %v2128_v9 = vpop.f32.mrf.mxu0 }
  0xf1   :  { %v111_v11 = vpop.f32.mrf.mxu0 }
  0xf2   :  { %v2665_v13 = vadd.f32 %v111_v11, %v63_v10 }
  0xf3   :  { %v2129_v14 = vpop.f32.mrf.mxu0 }
  0xf4   :  { %v131_v15 = vpack.c.bf16 %v2665_v13, %v2663_v12 }
  0xf6   :  { %2135 = vmatmul.mubr.msk.bf16.vlgmr.msra.gmra.mxu0 %vm153_vm2, %v131_v15  ;;  %v2729_v15 = vld [vmem:[#allocation7 + $0x40] sm:$0xff] }
 0x1b6   :  { %v191_v16 = vpop.f32.mrf.mxu0 }
 0x1b7   :  { %v192_v20 = vadd.f32 %v1956_v17, %v191_v16  ;;  %v2731_v16 = vld [vmem:[#allocation7 + $0x48] sm:$0xff] }
 0x1b8   :  { %v2136_v18 = vpop.f32.mrf.mxu0 }
 0x1ba   :  { %v194_v19 = vpop.f32.mrf.mxu0 }
 0x1bb   :  { %v195_v21 = vadd.f32 %v1956_v17, %v194_v19 }
 0x1bc   :  { %v2137_v22 = vpop.f32.mrf.mxu0 }
 0x1bd   :  { %v2403_v23 = vpack.i.bf16 %v195_v21, %v192_v20  ;;  %v2670_v24 = vpack.c.bf16 %v195_v21, %v192_v20 }
 0x1bf   :  { %2404 = vrot.lane.b32.xlu1 %v2403_v23, %s2611_s0  ;;  %2394 = vrot.lane.b32.xlu0 %v2403_v23, %s2612_s2 }
 0x1c0   :  { %2146 = vmatprep.mubr.msk.bf16.mxu0 %vm234_vm3, %v2670_v24 }
 0x1c3   :  { %2399 = vrot.lane.b32.xlu0 %v2403_v23, %s2613_s30 }
 0x231   :  { %v2405_v25 = vpop.permute.xlu1 %2404  ;;  %v2395_v26 = vpop.permute.xlu0 %2394 }
 0x232   :  { %v2397_v27 = vunpack.i.h.bf16 %v2395_v26  ;;  %v2396_v28 = vunpack.i.l.bf16 %v2395_v26  ;;  %v2407_v29 = vunpack.i.h.bf16 %v2405_v25  ;;  %v2406_v30 = vunpack.i.l.bf16 %v2405_v25 }
 0x234   :  { %v2677_v31 = vpack.c.bf16 %v2397_v27, %v2396_v28  ;;  %v2681_v35 = vpack.c.bf16 %v2407_v29, %v2406_v30 }
 0x235   :  { %v2400_v32 = vpop.permute.xlu0 %2399 }
 0x236   :  { %v2402_v33 = vunpack.i.h.bf16 %v2400_v32  ;;  %v2401_v34 = vunpack.i.l.bf16 %v2400_v32  ;;  %232 = vrot.lane.b32.xlu1 %v2677_v31, %s2614_s4 }
 0x238   :  { %v2683_v36 = vpack.c.bf16 %v2402_v33, %v2401_v34 }
 0x23a   :  { %230 = vrot.lane.b32.xlu0 %v2683_v36, %s2614_s4  ;;  %228 = vrot.lane.b32.xlu1 %v2681_v35, %s2614_s4 }
 0x23e   :  { %226 = vrot.lane.b32.xlu0 %v2670_v24, %s2614_s4 }
 0x2a8   :  { %v233_v37 = vpop.permute.xlu1 %232 }
 0x2a9   :  { %v257_v38 = vsel %vm234_vm3, %v233_v37, 0  ;;  %2366 = vmatprep.subr.msk.bf16.mxu0 %vm234_vm3, %v233_v37 }
 0x2aa   :  { %2139 = vmatpush3.bf16.xpose.msra.mxu0 %v257_v38 }
 0x2ac   :  { %v231_v39 = vpop.permute.xlu0 %230  ;;  %v229_v41 = vpop.permute.xlu1 %228 }
 0x2ad   :  { %2367 = vmatprep.subr.msk.bf16.mxu0 %vm234_vm3, %v231_v39  ;;  %v254_v40 = vsel %vm234_vm3, %v231_v39, 0  ;;  %v251_v42 = vsel %vm234_vm3, %v229_v41, 0 }
 0x2b0   :  { %v227_v43 = vpop.permute.xlu0 %226 }
 0x2b1   :  { %v248_v44 = vsel %vm234_vm3, %v227_v43, 0 }
 0x2b2   :  { %2141 = vmatpush3.bf16.xpose.msra.mxu0 %v254_v40 }
 0x2b3   :  { %2368 = vmatprep.subr.msk.bf16.mxu0 %vm234_vm3, %v229_v41 }
 0x2ba   :  { %2143 = vmatpush3.bf16.xpose.msra.mxu0 %v251_v42 }
 0x2bb   :  { %2369 = vmatprep.subr.msk.bf16.mxu0 %vm234_vm3, %v227_v43 }
 0x2c2   :  { %2145 = vmatpush3.bf16.xpose.msra.mxu0 %v248_v44 }
 0x2c3   :  { %2180 = vmatprep.subr.bf16.mxu0 %v2609_v0 }
 0x2c9   :  { %2147 = vmatmul.mubr.msk.bf16.vlgmr.msra.gmra.mxu0 %vm234_vm3, %v2681_v35 }
 0x2ca   :  { %2150 = vmatprep.mubr.msk.bf16.mxu0 %vm234_vm3, %v2683_v36 }
 0x2d1   :  { %2151 = vmatmul.mubr.msk.bf16.gmra.mxu0 %vm234_vm3, %v2677_v31 }
 0x2d2   :  { %2188 = vmatprep.mubr.msk.bf16.mxu0 %vm2610_vm0, %v2609_v0 }
 0x389   :  { %v2148_v45 = vpop.f32.mrf.mxu0 }
 0x38a   :  { %v326_v53 = vmul.f32 0.17677669, %v2148_v45 }
 0x38b   :  { %v293_v46 = vpop.f32.mrf.mxu0 }
 0x38c   :  { %v324_v48 = vmul.f32 0.17677669, %v293_v46  ;;  %v334_v63 = vadd.f32 %v326_v53, %v2717_v59 }
 0x38d   :  { %v2149_v49 = vpop.f32.mrf.mxu0 }
 0x38e   :  { %v327_v51 = vmul.f32 0.17677669, %v2149_v49  ;;  %v332_v52 = vadd.f32 %v324_v48, %v2708_v47  ;;  %v347_v7 = vsel %vm340_vm4, %v334_v63, -inf }
 0x38f   :  { %v296_v54 = vpop.f32.mrf.mxu0 }
 0x390   :  { %v325_v56 = vmul.f32 0.17677669, %v296_v54  ;;  %v341_v57 = vsel %vm340_vm4, %v332_v52, -inf  ;;  %v335_v58 = vadd.f32 %v327_v51, %v2710_v50 }
 0x391   :  { %342 = vmax.xlane.f32.xlu1 %v341_v57  ;;  %v2152_v60 = vpop.f32.mrf.mxu0 }
 0x392   :  { %v333_v61 = vadd.f32 %v325_v56, %v2713_v55  ;;  %v350_v2 = vsel %vm340_vm4, %v335_v58, -inf  ;;  %v330_v9 = vmul.f32 0.17677669, %v2152_v60 }
 0x393   :  { %v309_v62 = vpop.f32.mrf.mxu0 }
 0x394   :  { %v328_v1 = vmul.f32 0.17677669, %v309_v62  ;;  %v344_v3 = vsel %vm340_vm4, %v333_v61, -inf  ;;  %v338_v20 = vadd.f32 %v330_v9, %v2729_v15 }
 0x395   :  { %351 = vmax.xlane.f32.xlu1 %v350_v2  ;;  %345 = vmax.xlane.f32.xlu0 %v344_v3  ;;  %v2153_v4 = vpop.f32.mrf.mxu0 }
 0x396   :  { %v331_v10 = vmul.f32 0.17677669, %v2153_v4  ;;  %v336_v14 = vadd.f32 %v328_v1, %v2723_v5  ;;  %v359_v22 = vsel %vm340_vm4, %v338_v20, -inf }
 0x397   :  { %v312_v6 = vpop.f32.mrf.mxu0 }
 0x398   :  { %v329_v11 = vmul.f32 0.17677669, %v312_v6  ;;  %v353_v18 = vsel %vm340_vm4, %v336_v14, -inf  ;;  %v339_v21 = vadd.f32 %v331_v10, %v2731_v16 }
 0x399   :  { %348 = vmax.xlane.f32.xlu0 %v347_v7 }
 0x39a   :  { %v337_v17 = vadd.f32 %v329_v11, %v2726_v8  ;;  %v362_v23 = vsel %vm340_vm4, %v339_v21, -inf }
 0x39c   :  { %v356_v19 = vsel %vm340_vm4, %v337_v17, -inf }
 0x39d   :  { %354 = vmax.xlane.f32.xlu0 %v353_v18  ;;  %357 = vmax.xlane.f32.xlu1 %v356_v19 }
 0x3a1   :  { %360 = vmax.xlane.f32.xlu0 %v359_v22  ;;  %363 = vmax.xlane.f32.xlu1 %v362_v23 }
 0x3b2   :  { %437 = vrot.lane.b32.xlu1 %v2683_v36, %s2615_s5 }
 0x3b7   :  { %439 = vrot.lane.b32.xlu0 %v2677_v31, %s2615_s5 }
 0x41a   :  { %v343_v25 = vpop.xlane.xlu1 %342 }
 0x41b   :  { %v365_v30 = vsub.f32 %v332_v52, %v343_v25 }
 0x41d   :  { %v373_v38 = vmul.f32 1.442695, %v365_v30 }
 0x41e   :  { %v352_v26 = vpop.xlane.xlu1 %351  ;;  %v346_v27 = vpop.xlane.xlu0 %345 }
 0x41f   :  { %v368_v28 = vsub.f32 %v335_v58, %v352_v26  ;;  %v366_v29 = vsub.f32 %v333_v61, %v346_v27 }
 0x421   :  { %v379_v32 = vmul.f32 1.442695, %v368_v28  ;;  %v375_v33 = vmul.f32 1.442695, %v366_v29 }
 0x422   :  { %v349_v34 = vpop.xlane.xlu0 %348 }
 0x423   :  { %2444 = vpow2.f32 %v379_v32  ;;  %v367_v37 = vsub.f32 %v334_v63, %v349_v34 }
 0x424   :  { %2446 = vpow2.f32 %v375_v33  ;;  %v526_v33 = vld [vmem:[#allocation5 + $0x38] sm:$0xf] }
 0x425   :  { %v377_v39 = vmul.f32 1.442695, %v367_v37 }
 0x426   :  { %v355_v40 = vpop.xlane.xlu0 %354  ;;  %v358_v41 = vpop.xlane.xlu1 %357 }
 0x427   :  { %2448 = vpow2.f32 %v377_v39  ;;  %v369_v36 = vsub.f32 %v336_v14, %v355_v40  ;;  %v370_v31 = vsub.f32 %v337_v17, %v358_v41  ;;  %v541_v39 = vsel %vm539_vm5, %v526_v33, 0 }
 0x428   :  { %2450 = vpow2.f32 %v373_v38 }
 0x429   :  { %v381_v46 = vmul.f32 1.442695, %v369_v36  ;;  %v383_v51 = vmul.f32 1.442695, %v370_v31 }
 0x42a   :  { %v361_v42 = vpop.xlane.xlu0 %360  ;;  %v364_v43 = vpop.xlane.xlu1 %363 }
 0x42b   :  { %v371_v44 = vsub.f32 %v338_v20, %v361_v42  ;;  %v372_v45 = vsub.f32 %v339_v21, %v364_v43 }
 0x42d   :  { %v385_v48 = vmul.f32 1.442695, %v371_v44  ;;  %v387_v49 = vmul.f32 1.442695, %v372_v45 }
 0x42e   :  { %v440_v52 = vpop.permute.xlu0 %439  ;;  %v438_v54 = vpop.permute.xlu1 %437 }
 0x42f   :  { %2452 = vpow2.f32 %v385_v48  ;;  %2154 = vmatprep.subr.bf16.mxu1 %v440_v52 }
 0x430   :  { %v2744_v53 = vpop.eup %2444  ;;  %2454 = vpow2.f32 %v387_v49  ;;  %2155 = vmatpush3.bf16.msra.mxu1 %v440_v52 }
 0x431   :  { %2456 = vpow2.f32 %v381_v46  ;;  %2156 = vmatprep.subr.bf16.mxu1 %v438_v54  ;;  %v398_v56 = vsel %vm340_vm4, %v2744_v53, 0.0  ;;  %v2447_v57 = vpop.eup %2446 }
 0x432   :  { %2458 = vpow2.f32 %v383_v51  ;;  %399 = vadd.xlane.f32.xlu1 %v398_v56  ;;  %v392_v61 = vsel %vm340_vm4, %v2447_v57, 0.0 }
 0x434   :  { %v2449_v58 = vpop.eup %2448  ;;  %2157 = vmatpush3.bf16.msra.mxu1 %v438_v54 }
 0x435   :  { %v395_v60 = vsel %vm340_vm4, %v2449_v58, 0.0  ;;  %v2451_v62 = vpop.eup %2450 }
 0x436   :  { %396 = vadd.xlane.f32.xlu0 %v395_v60  ;;  %393 = vadd.xlane.f32.xlu1 %v392_v61  ;;  %v389_v63 = vsel %vm340_vm4, %v2451_v62, 0.0 }
 0x43a   :  { %390 = vadd.xlane.f32.xlu0 %v389_v63 }
 0x43c   :  { %v2453_v1 = vpop.eup %2452 }
 0x43d   :  { %v2455_v2 = vpop.eup %2454  ;;  %v407_v3 = vsel %vm340_vm4, %v2453_v1, 0.0 }
 0x43e   :  { %v2457_v4 = vpop.eup %2456  ;;  %408 = vadd.xlane.f32.xlu0 %v407_v3  ;;  %v410_v6 = vsel %vm340_vm4, %v2455_v2, 0.0 }
 0x43f   :  { %v2459_v7 = vpop.eup %2458  ;;  %411 = vadd.xlane.f32.xlu1 %v410_v6  ;;  %v401_v9 = vsel %vm340_vm4, %v2457_v4, 0.0 }
 0x440   :  { %v404_v10 = vsel %vm340_vm4, %v2459_v7, 0.0 }
 0x442   :  { %402 = vadd.xlane.f32.xlu0 %v401_v9 }
 0x443   :  { %405 = vadd.xlane.f32.xlu1 %v404_v10 }
 0x454   :  { %435 = vrot.lane.b32.xlu1 %v2681_v35, %s2615_s5 }
 0x458   :  { %433 = vrot.lane.b32.xlu0 %v2670_v24, %s2615_s5 }
 0x4bb   :  { %v400_v11 = vpop.xlane.xlu1 %399 }
 0x4bf   :  { %v397_v14 = vpop.xlane.xlu0 %396  ;;  %v394_v17 = vpop.xlane.xlu1 %393 }
 0x4c0   :  { %2460 = vrcp.f32 %v394_v17 }
 0x4c1   :  { %2462 = vrcp.f32 %v397_v14 }
 0x4c3   :  { %v391_v18 = vpop.xlane.xlu0 %390 }
 0x4c4   :  { %2464 = vrcp.f32 %v391_v18  ;;  %v2782_v18 = vld [vmem:[#allocation5 + $0x8] sm:$0xff]  }
 0x4c5   :  { %2466 = vrcp.f32 %v400_v11 }
 0x4c7   :  { %v409_v19 = vpop.xlane.xlu0 %408 }
 0x4c8   :  { %v412_v20 = vpop.xlane.xlu1 %411  ;;  %2468 = vrcp.f32 %v409_v19 }
 0x4c9   :  { %2470 = vrcp.f32 %v412_v20 }
 0x4cb   :  { %v403_v21 = vpop.xlane.xlu0 %402 }
 0x4cc   :  { %2472 = vrcp.f32 %v403_v21  ;;  %v406_v22 = vpop.xlane.xlu1 %405 }
 0x4cd   :  { %2474 = vrcp.f32 %v406_v22  ;;  %v2461_v35 = vpop.eup %2460 }
 0x4ce   :  { %v2463_v23 = vpop.eup %2462  ;;  %v422_v29 = vmul.f32 %v2461_v35, %v2447_v57 }
 0x4cf   :  { %v434_v27 = vpop.permute.xlu0 %433  ;;  %v423_v30 = vmul.f32 %v2463_v23, %v2449_v58 }
 0x4d0   :  { %v436_v25 = vpop.permute.xlu1 %435 }
 0x4d1   :  { %v2465_v24 = vpop.eup %2464  ;;  %2158 = vmatprep.subr.bf16.mxu1 %v436_v25 }
 0x4d2   :  { %v2467_v26 = vpop.eup %2466  ;;  %2159 = vmatpush3.bf16.msra.mxu1 %v436_v25  ;;  %v421_v28 = vmul.f32 %v2465_v24, %v2451_v62  ;;  %v2799_v24 = vld [vmem:[#allocation5 + $0x10] sm:$0xff]  }
 0x4d3   :  { %2160 = vmatprep.subr.bf16.mxu1 %v434_v27  ;;  %v424_v34 = vmul.f32 %v2467_v26, %v2744_v53 }
 0x4d4   :  { %v429_v32 = vpack.c.bf16 %v422_v29, %v421_v28  ;;  %v2809_v29 = vld [vmem:[#allocation5 + $0x18] sm:$0xff]  }
 0x4d5   :  { %v2469_v37 = vpop.eup %2468  ;;  %v430_v38 = vpack.c.bf16 %v424_v34, %v423_v30 }
 0x4d6   :  { %2161 = vmatpush3.bf16.msra.mxu1 %v434_v27  ;;  %2162 = vmatprep.mubr.msk.bf16.mxu1 %vm340_vm4, %v429_v32  ;;  %v2471_v40 = vpop.eup %2470  ;;  %v427_v43 = vmul.f32 %v2469_v37, %v2453_v1 }
 0x4d7   :  { %2370 = vmatprep.subr.msk.bf16.mxu1 %vm539_vm5, %v526_v33  ;;  %v428_v44 = vmul.f32 %v2471_v40, %v2455_v2  ;;  %v2818_v33 = vld [vmem:[#allocation5 + $0x20] sm:$0xff]   ;;  %v662_v40 = vlaneseq }
 0x4d9   :  { %v2473_v41 = vpop.eup %2472  ;;  %2163 = vmatmul.mubr.msk.bf16.vlgmr.msra.gmra.mxu1 %vm340_vm4, %v430_v38  ;;  %v432_v46 = vpack.c.bf16 %v428_v44, %v427_v43 }
 0x4da   :  { %v2475_v36 = vpop.eup %2474  ;;  %v425_v31 = vmul.f32 %v2473_v41, %v2457_v4  ;;  %2171 = vmatpush3.bf16.msra.mxu1 %v541_v39  ;;  %v2825_v41 = vshrl.u32 %v662_v40, 7 }
 0x4db   :  { %v426_v42 = vmul.f32 %v2475_v36, %v2459_v7  ;;  %2192 = vmatprep.subr.bf16.mxu1 %v2609_v0 }
 0x4dc   :  { %v898_v40 = vsub.s32 2, %v2825_v41 }
 0x4dd   :  { %v431_v45 = vpack.c.bf16 %v426_v42, %v425_v31  ;;  %v664_v31 = vsub.s32 0, %v2825_v41  ;;  %v2828_v42 = vld [vmem:[#allocation7 + $0x58] sm:$0xf] }
 0x4df   :  { %2166 = vmatprep.mubr.msk.bf16.mxu1 %vm340_vm4, %v431_v45  ;;  %v665_v45 = vrot.slane %v2828_v42, %v664_v31 }
 0x4e1   :  { %2167 = vmatmul.mubr.msk.bf16.gmra.mxu1 %vm340_vm4, %v432_v46 }
 0x599   :  { %v2164_v48 = vpop.f32.mrf.mxu1 }
 0x59b   :  { %v491_v49 = vpop.f32.mrf.mxu1 }
 0x59d   :  { %v2165_v51 = vpop.f32.mrf.mxu1 }
 0x59e   :  { %v523_v54 = vpack.c.bf16 %v2165_v51, %v2164_v48 }
 0x59f   :  { %v494_v52 = vpop.f32.mrf.mxu1 }
 0x5a0   :  { %v522_v53 = vpack.c.bf16 %v494_v52, %v491_v49 }
 0x5a1   :  { %v2168_v56 = vpop.f32.mrf.mxu1 }
 0x5a2   :  { %2172 = vmatprep.mubr.msk.bf16.mxu1 %vm234_vm3, %v522_v53 }
 0x5a3   :  { %v507_v57 = vpop.f32.mrf.mxu1  ;;  %2173 = vmatmul.mubr.msk.bf16.vlgmr.msra.gmra.mxu1 %vm234_vm3, %v523_v54 }
 0x5a5   :  { %v2169_v58 = vpop.f32.mrf.mxu1 }
 0x5a6   :  { %v525_v62 = vpack.c.bf16 %v2169_v58, %v2168_v56 }
 0x5a7   :  { %v510_v60 = vpop.f32.mrf.mxu1 }
 0x5a8   :  { %v524_v61 = vpack.c.bf16 %v510_v60, %v507_v57 }
 0x5aa   :  { %2176 = vmatprep.mubr.msk.bf16.mxu1 %vm234_vm3, %v524_v61 }
 0x5ab   :  { %2177 = vmatmul.mubr.msk.bf16.gmra.mxu1 %vm234_vm3, %v525_v62 }
 0x5ac   :  { %2200 = vmatprep.mubr.msk.bf16.mxu1 %vm2610_vm0, %v2609_v0 }
 0x663   :  { %v2174_v63 = vpop.f32.mrf.mxu1 }
 0x665   :  { %v577_v1 = vpop.f32.mrf.mxu1 }
 0x667   :  { %v2175_v2 = vpop.f32.mrf.mxu1 }
 0x668   :  { %v610_v14 = vpack.c.bf16 %v2175_v2, %v2174_v63 }
 0x669   :  { %v580_v3 = vpop.f32.mrf.mxu1 }
 0x66a   :  { %v609_v17 = vpack.c.bf16 %v580_v3, %v577_v1 }
 0x66b   :  { %v2178_v4 = vpop.f32.mrf.mxu1 }
 0x66d   :  { %v593_v6 = vpop.f32.mrf.mxu1 }
 0x66f   :  { %v2179_v7 = vpop.f32.mrf.mxu1 }
 0x670   :  { %v612_v9 = vpack.c.bf16 %v2179_v7, %v2178_v4 }
 0x671   :  { %v596_v10 = vpop.f32.mrf.mxu1 }
 0x672   :  { %v611_v11 = vpack.c.bf16 %v596_v10, %v593_v6  ;;  %683 = vrot.lane.b32.xlu1 %v612_v9, %s2616_s6  ;;  %2181 = vmatpush3.bf16.msra.mxu0 %v612_v9 }
 0x673   :  { %2182 = vmatprep.subr.bf16.mxu0 %v2609_v0 }
 0x674   :  { %681 = vrot.lane.b32.xlu0 %v611_v11, %s2616_s6 }
 0x676   :  { %679 = vrot.lane.b32.xlu1 %v610_v14, %s2616_s6  ;;  %2183 = vmatpush3.bf16.msra.mxu0 %v611_v11 }
 0x677   :  { %2184 = vmatprep.subr.bf16.mxu0 %v2609_v0 }
 0x678   :  { %677 = vrot.lane.b32.xlu0 %v609_v17, %s2616_s6 }
 0x67a   :  { %746 = vrot.lane.b32.xlu1 %v612_v9, %s2603_s15  ;;  %2185 = vmatpush3.bf16.msra.mxu0 %v610_v14 }
 0x67b   :  { %2186 = vmatprep.subr.bf16.mxu0 %v2609_v0 }
 0x67c   :  { %809 = vrot.lane.b32.xlu0 %v612_v9, %s2617_s7 }
 0x67e   :  { %744 = vrot.lane.b32.xlu1 %v611_v11, %s2603_s15  ;;  %2187 = vmatpush3.bf16.msra.mxu0 %v609_v17 }
 0x67f   :  { %2204 = vmatprep.subr.bf16.mxu0 %v2609_v0 }
 0x680   :  { %807 = vrot.lane.b32.xlu0 %v611_v11, %s2617_s7 }
 0x681   :  { %2189 = vmatmul.mubr.msk.bf16.vlgmr.msra.gmra.mxu0 %vm340_vm4, %v2782_v18 }
 0x682   :  { %742 = vrot.lane.b32.xlu1 %v610_v14, %s2603_s15  ;;  %2212 = vmatprep.mubr.msk.bf16.mxu0 %vm2610_vm0, %v2609_v0 }
 0x684   :  { %805 = vrot.lane.b32.xlu0 %v610_v14, %s2617_s7 }
 0x686   :  { %740 = vrot.lane.b32.xlu1 %v609_v17, %s2603_s15 }
 0x688   :  { %803 = vrot.lane.b32.xlu0 %v609_v17, %s2617_s7 }
 0x6e4   :  { %v684_v19 = vpop.permute.xlu1 %683 }
 0x6e5   :  { %2193 = vmatpush3.bf16.msra.mxu1 %v684_v19 }
 0x6e6   :  { %v682_v20 = vpop.permute.xlu0 %681  ;;  %2194 = vmatprep.subr.bf16.mxu1 %v2609_v0 }
 0x6e8   :  { %v680_v21 = vpop.permute.xlu1 %679 }
 0x6e9   :  { %2195 = vmatpush3.bf16.msra.mxu1 %v682_v20 }
 0x6ea   :  { %v678_v22 = vpop.permute.xlu0 %677  ;;  %2196 = vmatprep.subr.bf16.mxu1 %v2609_v0 }
 0x6ec   :  { %v747_v35 = vpop.permute.xlu1 %746 }
 0x6ed   :  { %2197 = vmatpush3.bf16.msra.mxu1 %v680_v21  ;;  %2205 = vmatpush3.bf16.msra.mxu0 %v747_v35 }
 0x6ee   :  { %v810_v23 = vpop.permute.xlu0 %809  ;;  %2198 = vmatprep.subr.bf16.mxu1 %v2609_v0  ;;  %2206 = vmatprep.subr.bf16.mxu0 %v2609_v0 }
 0x6f0   :  { %v745_v25 = vpop.permute.xlu1 %744 }
 0x6f1   :  { %2199 = vmatpush3.bf16.msra.mxu1 %v678_v22  ;;  %2207 = vmatpush3.bf16.msra.mxu0 %v745_v25  ;;  %v2432_v25 = vld [vmem:[#allocation5 + $0x68] sm:$0xff]  }
 0x6f2   :  { %2208 = vmatprep.subr.bf16.mxu0 %v2609_v0  ;;  %2216 = vmatprep.subr.bf16.mxu1 %v2609_v0  ;;  %v808_v26 = vpop.permute.xlu0 %807 }
 0x6f4   :  { %v743_v27 = vpop.permute.xlu1 %742  ;;  %2201 = vmatmul.mubr.msk.bf16.vlgmr.msra.gmra.mxu1 %vm340_vm4, %v2799_v24 }
 0x6f5   :  { %2209 = vmatpush3.bf16.msra.mxu0 %v743_v27  ;;  %2217 = vmatpush3.bf16.msra.mxu1 %v810_v23  ;;  %v2430_v23 = vld [vmem:[#allocation5 + $0x48] sm:$0xff]  }
 0x6f6   :  { %2210 = vmatprep.subr.bf16.mxu0 %v2609_v0  ;;  %2218 = vmatprep.subr.bf16.mxu1 %v2609_v0  ;;  %v806_v30 = vpop.permute.xlu0 %805 }
 0x6f7   :  { %2224 = vmatprep.mubr.msk.bf16.mxu1 %vm2610_vm0, %v2609_v0 }
 0x6f8   :  { %v741_v28 = vpop.permute.xlu1 %740 }
 0x6f9   :  { %2211 = vmatpush3.bf16.msra.mxu0 %v741_v28  ;;  %2219 = vmatpush3.bf16.msra.mxu1 %v808_v26 }
 0x6fa   :  { %2220 = vmatprep.subr.bf16.mxu1 %v2609_v0  ;;  %2228 = vmatprep.subr.bf16.mxu0 %v2609_v0  ;;  %v804_v32 = vpop.permute.xlu0 %803 }
 0x6fc   :  { %2213 = vmatmul.mubr.msk.bf16.vlgmr.msra.gmra.mxu0 %vm340_vm4, %v2809_v29 }
 0x6fd   :  { %2221 = vmatpush3.bf16.msra.mxu1 %v806_v30  ;;  %2232 = vmatprep.mubr.msk.bf16.mxu0 %vm2610_vm0, %v2609_v0 }
 0x6fe   :  { %2222 = vmatprep.subr.bf16.mxu1 %v2609_v0  ;;  %2229 = vmatpush3.bf16.msra.mxu0 %v2430_v23 }
 0x6ff   :  { %2230 = vmatprep.subr.bf16.mxu0 %v2609_v0 }
 0x701   :  { %2223 = vmatpush3.bf16.msra.mxu1 %v804_v32 }
 0x702   :  { %2236 = vmatprep.subr.bf16.mxu1 %v2609_v0 }
 0x704   :  { %2225 = vmatmul.mubr.msk.bf16.vlgmr.msra.gmra.mxu1 %vm340_vm4, %v2818_v33 }
 0x705   :  { %2244 = vmatprep.mubr.msk.bf16.mxu1 %vm2610_vm0, %v2609_v0  ;;  %2237 = vmatpush3.bf16.msra.mxu1 %v2432_v25 }
 0x706   :  { %2238 = vmatprep.subr.bf16.mxu1 %v2609_v0 }
 0x741   :  { %v655_v34 = vpop.f32.mrf.mxu0 }
 0x742   :  { %v666_v49 = vadd.f32 %v665_v45, %v655_v34 }
 0x743   :  { %v2190_v37 = vpop.f32.mrf.mxu0 }
 0x744   :  { %v892_v37 = vsub.s32 1, %v2825_v41 }
 0x745   :  { %v658_v38 = vpop.f32.mrf.mxu0 }
 0x746   :  { %v667_v56 = vadd.f32 %v665_v45, %v658_v38 }
 0x747   :  { %v2191_v39 = vpop.f32.mrf.mxu0 }
 0x748   :  { %v893_v39 = vrot.slane %v2828_v42, %v892_v37 }
 0x7b4   :  { %v726_v36 = vpop.f32.mrf.mxu1 }
 0x7b5   :  { %v733_v53 = vadd.f32 %v726_v36, %v666_v49 }
 0x7b6   :  { %v2202_v43 = vpop.f32.mrf.mxu1 }
 0x7b8   :  { %v729_v44 = vpop.f32.mrf.mxu1 }
 0x7b9   :  { %v734_v60 = vadd.f32 %v729_v44, %v667_v56  ;;  %v899_v44 = vrot.slane %v2828_v42, %v898_v40  ;;  %v2435_v56 = vld [vmem:[#allocation5 + $0x50] sm:$0xff]  }
 0x7ba   :  { %v2203_v46 = vpop.f32.mrf.mxu1 }
 0x7bc   :  { %v789_v48 = vpop.f32.mrf.mxu0 }
 0x7bd   :  { %v796_v57 = vadd.f32 %v789_v48, %v733_v53  ;;  %v2433_v53 = vld [vmem:[#allocation5 + $0x60] sm:$0xff]  }
 0x7be   :  { %v2214_v51 = vpop.f32.mrf.mxu0  ;;  %2239 = vmatpush3.bf16.msra.mxu1 %v2433_v53 }
 0x7bf   :  { %2240 = vmatprep.subr.bf16.mxu1 %v2609_v0 }
 0x7c0   :  { %v792_v52 = vpop.f32.mrf.mxu0 }
 0x7c1   :  { %v797_v63 = vadd.f32 %v792_v52, %v734_v60 }
 0x7c2   :  { %v2215_v54 = vpop.f32.mrf.mxu0 }
 0x7c3   :  { %v2434_v54 = vld [vmem:[#allocation5 + $0x58] sm:$0xff]  }
 0x7c4   :  { %v852_v58 = vpop.f32.mrf.mxu1  ;;  %2241 = vmatpush3.bf16.msra.mxu1 %v2434_v54 }
 0x7c5   :  { %v859_v61 = vadd.f32 %v852_v58, %v796_v57  ;;  %2242 = vmatprep.subr.bf16.mxu1 %v2609_v0  ;;  %v1980_v57 = vld [vmem:[#allocation7 + $0x60] ss:$0 sm:$0xff] }
 0x7c6   :  { %v2226_v62 = vpop.f32.mrf.mxu1 }
 0x7c7   :  { %v861_v1 = vadd.f32 %v859_v61, %v2663_v12 }
 0x7c8   :  { %v855_v2 = vpop.f32.mrf.mxu1  ;;  %2243 = vmatpush3.bf16.msra.mxu1 %v2435_v56 }
 0x7c9   :  { %v860_v3 = vadd.f32 %v855_v2, %v797_v63  ;;  %v863_v4 = vsel %vm153_vm2, %v861_v1, 0.0 }
 0x7ca   :  { %v2227_v6 = vpop.f32.mrf.mxu1  ;;  %864 = vadd.xlane.f32.xlu1 %v863_v4 }
 0x7cb   :  { %v862_v7 = vadd.f32 %v860_v3, %v2665_v13  ;;  %v2431_v13 = vld [vmem:[#allocation5 + $0x40] sm:$0xff]   ;;  %v2436_v6 = vld [vmem:[#allocation5 + $0x78] sm:$0xff]  }
 0x7cc   :  { %2231 = vmatpush3.bf16.msra.mxu0 %v2431_v13 }
 0x7cd   :  { %v866_v9 = vsel %vm153_vm2, %v862_v7, 0.0  ;;  %2248 = vmatprep.subr.bf16.mxu0 %v2609_v0 }
 0x7ce   :  { %867 = vadd.xlane.f32.xlu0 %v866_v9  ;;  %v981_v9 = vsub.s32 3, %v2825_v41 }
 0x853   :  { %v865_v10 = vpop.xlane.xlu1 %864 }
 0x854   :  { %v870_v11 = vmul.f32 0.03125, %v865_v10 }
 0x856   :  { %v872_v14 = vsub.f32 %v861_v1, %v870_v11  ;;  %v982_v11 = vrot.slane %v2828_v42, %v981_v9 }
 0x857   :  { %v868_v17 = vpop.xlane.xlu0 %867 }
 0x858   :  { %v871_v19 = vmul.f32 0.03125, %v868_v17  ;;  %v874_v20 = vmul.f32 %v872_v14, %v872_v14 }
 0x85a   :  { %v873_v21 = vsub.f32 %v862_v7, %v871_v19  ;;  %v876_v12 = vsel %vm153_vm2, %v874_v20, 0.0  ;;  %v2437_v7 = vld [vmem:[#allocation5 + $0x70] sm:$0xff]  }
 0x85b   :  { %877 = vadd.xlane.f32.xlu0 %v876_v12 }
 0x85c   :  { %v875_v22 = vmul.f32 %v873_v21, %v873_v21 }
 0x85e   :  { %v879_v35 = vsel %vm153_vm2, %v875_v22, 0.0 }
 0x85f   :  { %880 = vadd.xlane.f32.xlu1 %v879_v35  ;;  %v1989_v35 = vld [vmem:[#allocation7 + $0x68] ss:$0 sm:$0xff] }
 0x8e4   :  { %v878_v26 = vpop.xlane.xlu0 %877 }
 0x8e5   :  { %v882_v27 = vmul.f32 0.03125, %v878_v26 }
 0x8e7   :  { %v884_v28 = vadd.f32 1e-05, %v882_v27 }
 0x8e8   :  { %v881_v30 = vpop.xlane.xlu1 %880 }
 0x8e9   :  { %2476 = vrsqrt.f32 %v884_v28  ;;  %v883_v32 = vmul.f32 0.03125, %v881_v30 }
 0x8eb   :  { %v885_v34 = vadd.f32 1e-05, %v883_v32 }
 0x8ed   :  { %2478 = vrsqrt.f32 %v885_v34 }
 0x8f6   :  { %v2477_v38 = vpop.eup %2476 }
 0x8f7   :  { %v888_v36 = vmul.f32 %v2477_v38, %v872_v14 }
 0x8f9   :  { %v894_v46 = vmul.f32 %v893_v39, %v888_v36 }
 0x8fa   :  { %v2479_v43 = vpop.eup %2478 }
 0x8fb   :  { %v889_v45 = vmul.f32 %v2479_v43, %v873_v21  ;;  %v900_v49 = vadd.f32 %v899_v44, %v894_v46 }
 0x8fd   :  { %v895_v48 = vmul.f32 %v893_v39, %v889_v45 }
 0x8ff   :  { %v901_v51 = vadd.f32 %v899_v44, %v895_v48 }
 0x901   :  { %v902_v52 = vpack.c.bf16 %v901_v51, %v900_v49 }
 0x903   :  { %2233 = vmatmul.mubr.msk.bf16.vlgmr.msra.gmra.mxu0 %vm153_vm2, %v902_v52 }
 0x904   :  { %2252 = vmatprep.mubr.msk.bf16.mxu0 %vm2610_vm0, %v2609_v0  ;;  %2249 = vmatpush3.bf16.msra.mxu0 %v2436_v6 }
 0x905   :  { %2250 = vmatprep.subr.bf16.mxu0 %v2609_v0 }
 0x908   :  { %2251 = vmatpush3.bf16.msra.mxu0 %v2437_v7 }
 0x9c3   :  { %v961_v58 = vpop.f32.mrf.mxu0 }
 0x9c4   :  { %v962_v61 = vadd.f32 %v1980_v57, %v961_v58 }
 0x9c5   :  { %v2234_v60 = vpop.f32.mrf.mxu0 }
 0x9c6   :  { %v968_v2 = vmax.f32 %v962_v61, 0.0 }
 0x9c7   :  { %v964_v62 = vpop.f32.mrf.mxu0 }
 0x9c8   :  { %v965_v63 = vadd.f32 %v1980_v57, %v964_v62 }
 0x9c9   :  { %v2235_v1 = vpop.f32.mrf.mxu0 }
 0x9ca   :  { %v969_v3 = vmax.f32 %v965_v63, 0.0 }
 0x9cc   :  { %v970_v4 = vpack.c.bf16 %v969_v3, %v968_v2 }
 0x9ce   :  { %2245 = vmatmul.mubr.msk.bf16.vlgmr.msra.gmra.mxu1 %vm340_vm4, %v970_v4 }
 0xa8e   :  { %v1044_v10 = vpop.f32.mrf.mxu1 }
 0xa8f   :  { %v2861_v19 = vadd.f32 %v1044_v10, %v982_v11 }
 0xa90   :  { %v2246_v14 = vpop.f32.mrf.mxu1 }
 0xa92   :  { %v1047_v17 = vpop.f32.mrf.mxu1 }
 0xa93   :  { %v2863_v20 = vadd.f32 %v1047_v17, %v982_v11 }
 0xa94   :  { %v2247_v21 = vpop.f32.mrf.mxu1 }
 0xa95   :  { %v1051_v12 = vpack.c.bf16 %v2863_v20, %v2861_v19 }
 0xa97   :  { %2253 = vmatmul.mubr.msk.bf16.vlgmr.msra.gmra.mxu0 %vm153_vm2, %v1051_v12 }
 0xb57   :  { %v1110_v22 = vpop.f32.mrf.mxu0 }
 0xb58   :  { %v1111_v25 = vadd.f32 %v1989_v35, %v1110_v22 }
 0xb59   :  { %v2254_v23 = vpop.f32.mrf.mxu0 }
 0xb5b   :  { %v1113_v13 = vpop.f32.mrf.mxu0 }
 0xb5c   :  { %v1114_v26 = vadd.f32 %v1989_v35, %v1113_v13 }
 0xb5d   :  { %v2255_v27 = vpop.f32.mrf.mxu0 }
 0xb5e   :  { %v2413_v42 = vpack.i.bf16 %v1114_v26, %v1111_v25  ;;  %v2868_v28 = vpack.c.bf16 %v1114_v26, %v1111_v25 }
 0xb60   :  { %2414 = vrot.lane.b32.xlu1 %v2413_v42, %s2613_s30  ;;  %2409 = vrot.lane.b32.xlu0 %v2413_v42, %s2612_s2 }
 0xb61   :  { %2264 = vmatprep.mubr.msk.bf16.mxu0 %vm234_vm3, %v2868_v28 }
 0xb64   :  { %2419 = vrot.lane.b32.xlu1 %v2413_v42, %s2611_s0 }
 0xbd2   :  { %v2415_v30 = vpop.permute.xlu1 %2414  ;;  %v2410_v32 = vpop.permute.xlu0 %2409 }
 0xbd3   :  { %v2417_v34 = vunpack.i.h.bf16 %v2415_v30  ;;  %v2416_v38 = vunpack.i.l.bf16 %v2415_v30  ;;  %v2412_v39 = vunpack.i.h.bf16 %v2410_v32  ;;  %v2411_v36 = vunpack.i.l.bf16 %v2410_v32 }
 0xbd5   :  { %v2875_v43 = vpack.c.bf16 %v2417_v34, %v2416_v38  ;;  %v2877_v44 = vpack.c.bf16 %v2412_v39, %v2411_v36 }
 0xbd6   :  { %v2420_v45 = vpop.permute.xlu1 %2419 }
 0xbd7   :  { %v2422_v46 = vunpack.i.h.bf16 %v2420_v45  ;;  %v2421_v48 = vunpack.i.l.bf16 %v2420_v45  ;;  %1149 = vrot.lane.b32.xlu1 %v2875_v43, %s2614_s4  ;;  %1151 = vrot.lane.b32.xlu0 %v2877_v44, %s2614_s4 }
 0xbd9   :  { %v2883_v49 = vpack.c.bf16 %v2422_v46, %v2421_v48 }
 0xbdb   :  { %1147 = vrot.lane.b32.xlu0 %v2883_v49, %s2614_s4  ;;  %1145 = vrot.lane.b32.xlu1 %v2868_v28, %s2614_s4 }
 0xc49   :  { %v1152_v51 = vpop.permute.xlu0 %1151  ;;  %v1150_v53 = vpop.permute.xlu1 %1149 }
 0xc4a   :  { %v1175_v52 = vsel %vm234_vm3, %v1152_v51, 0  ;;  %2371 = vmatprep.subr.msk.bf16.mxu0 %vm234_vm3, %v1152_v51  ;;  %v1172_v54 = vsel %vm234_vm3, %v1150_v53, 0 }
 0xc4b   :  { %2257 = vmatpush3.bf16.xpose.msra.mxu0 %v1175_v52 }
 0xc4c   :  { %2372 = vmatprep.subr.msk.bf16.mxu0 %vm234_vm3, %v1150_v53 }
 0xc4d   :  { %v1148_v56 = vpop.permute.xlu0 %1147  ;;  %v1146_v58 = vpop.permute.xlu1 %1145 }
 0xc4e   :  { %v1169_v57 = vsel %vm234_vm3, %v1148_v56, 0  ;;  %v1166_v60 = vsel %vm234_vm3, %v1146_v58, 0 }
 0xc53   :  { %2259 = vmatpush3.bf16.xpose.msra.mxu0 %v1172_v54 }
 0xc54   :  { %2373 = vmatprep.subr.msk.bf16.mxu0 %vm234_vm3, %v1148_v56 }
 0xc5b   :  { %2261 = vmatpush3.bf16.xpose.msra.mxu0 %v1169_v57 }
 0xc5c   :  { %2374 = vmatprep.subr.msk.bf16.mxu0 %vm234_vm3, %v1146_v58 }
 0xc63   :  { %2263 = vmatpush3.bf16.xpose.msra.mxu0 %v1166_v60 }
 0xc64   :  { %2298 = vmatprep.subr.bf16.mxu0 %v2609_v0 }
 0xc6a   :  { %2265 = vmatmul.mubr.msk.bf16.vlgmr.msra.gmra.mxu0 %vm234_vm3, %v2883_v49 }
 0xc6b   :  { %2268 = vmatprep.mubr.msk.bf16.mxu0 %vm234_vm3, %v2875_v43 }
 0xc72   :  { %2269 = vmatmul.mubr.msk.bf16.gmra.mxu0 %vm234_vm3, %v2877_v44 }
 0xc73   :  { %2306 = vmatprep.mubr.msk.bf16.mxu0 %vm2610_vm0, %v2609_v0 }
 0xd2a   :  { %v2266_v61 = vpop.f32.mrf.mxu0 }
 0xd2b   :  { %v1244_v63 = vmul.f32 0.17677669, %v2266_v61 }
 0xd2c   :  { %v1211_v62 = vpop.f32.mrf.mxu0 }
 0xd2d   :  { %v1242_v1 = vmul.f32 0.17677669, %v1211_v62  ;;  %v1252_v11 = vadd.f32 %v1244_v63, %v2717_v59 }
 0xd2e   :  { %v2267_v2 = vpop.f32.mrf.mxu0 }
 0xd2f   :  { %v1250_v3 = vadd.f32 %v1242_v1, %v2708_v47  ;;  %v1245_v4 = vmul.f32 0.17677669, %v2267_v2  ;;  %v1264_v23 = vsel %vm340_vm4, %v1252_v11, -inf }
 0xd30   :  { %v1214_v6 = vpop.f32.mrf.mxu0 }
 0xd31   :  { %v1243_v7 = vmul.f32 0.17677669, %v1214_v6  ;;  %v1258_v10 = vsel %vm340_vm4, %v1250_v3, -inf  ;;  %v1253_v12 = vadd.f32 %v1245_v4, %v2710_v50 }
 0xd32   :  { %1259 = vmax.xlane.f32.xlu0 %v1258_v10  ;;  %v2270_v14 = vpop.f32.mrf.mxu0 }
 0xd33   :  { %v1251_v17 = vadd.f32 %v1243_v7, %v2713_v55  ;;  %v1248_v22 = vmul.f32 0.17677669, %v2270_v14  ;;  %v1267_v59 = vsel %vm340_vm4, %v1253_v12, -inf }
 0xd34   :  { %v1227_v21 = vpop.f32.mrf.mxu0 }
 0xd35   :  { %v1246_v35 = vmul.f32 0.17677669, %v1227_v21  ;;  %v1261_v47 = vsel %vm340_vm4, %v1251_v17, -inf  ;;  %v1256_v50 = vadd.f32 %v1248_v22, %v2729_v15 }
 0xd36   :  { %1265 = vmax.xlane.f32.xlu0 %v1264_v23  ;;  %1262 = vmax.xlane.f32.xlu1 %v1261_v47  ;;  %v2271_v13 = vpop.f32.mrf.mxu0 }
 0xd37   :  { %v1254_v25 = vadd.f32 %v1246_v35, %v2723_v5  ;;  %v1249_v27 = vmul.f32 0.17677669, %v2271_v13  ;;  %v1276_v32 = vsel %vm340_vm4, %v1256_v50, -inf }
 0xd38   :  { %v1230_v26 = vpop.f32.mrf.mxu0 }
 0xd39   :  { %v1247_v42 = vmul.f32 0.17677669, %v1230_v26  ;;  %v1270_v55 = vsel %vm340_vm4, %v1254_v25, -inf  ;;  %v1257_v38 = vadd.f32 %v1249_v27, %v2731_v16 }
 0xd3a   :  { %1268 = vmax.xlane.f32.xlu0 %v1267_v59  ;;  %1271 = vmax.xlane.f32.xlu1 %v1270_v55 }
 0xd3b   :  { %v1255_v30 = vadd.f32 %v1247_v42, %v2726_v8  ;;  %v1279_v5 = vsel %vm340_vm4, %v1257_v38, -inf }
 0xd3d   :  { %v1273_v34 = vsel %vm340_vm4, %v1255_v30, -inf }
 0xd3e   :  { %1277 = vmax.xlane.f32.xlu1 %v1276_v32  ;;  %1274 = vmax.xlane.f32.xlu0 %v1273_v34 }
 0xd42   :  { %1280 = vmax.xlane.f32.xlu0 %v1279_v5 }
 0xd4f   :  { %1356 = vrot.lane.b32.xlu1 %v2877_v44, %s2615_s5 }
 0xdbb   :  { %v1260_v39 = vpop.xlane.xlu0 %1259 }
 0xdbc   :  { %v1282_v15 = vsub.f32 %v1250_v3, %v1260_v39 }
 0xdbe   :  { %v1290_v8 = vmul.f32 1.442695, %v1282_v15 }
 0xdbf   :  { %v1266_v36 = vpop.xlane.xlu0 %1265  ;;  %v1263_v45 = vpop.xlane.xlu1 %1262 }
 0xdc0   :  { %v1284_v46 = vsub.f32 %v1252_v11, %v1266_v36  ;;  %v1283_v51 = vsub.f32 %v1251_v17, %v1263_v45 }
 0xdc2   :  { %v1294_v48 = vmul.f32 1.442695, %v1284_v46  ;;  %v1292_v54 = vmul.f32 1.442695, %v1283_v51 }
 0xdc3   :  { %v1269_v52 = vpop.xlane.xlu0 %1268  ;;  %v1272_v53 = vpop.xlane.xlu1 %1271 }
 0xdc4   :  { %2480 = vpow2.f32 %v1294_v48  ;;  %v1285_v16 = vsub.f32 %v1253_v12, %v1269_v52  ;;  %v1286_v57 = vsub.f32 %v1254_v25, %v1272_v53  ;;  %v1443_v53 = vld [vmem:[#allocation5 + $0x80] sm:$0xf] }
 0xdc5   :  { %2482 = vpow2.f32 %v1290_v8 }
 0xdc6   :  { %v1296_v56 = vmul.f32 1.442695, %v1285_v16  ;;  %v1298_v61 = vmul.f32 1.442695, %v1286_v57 }
 0xdc7   :  { %v1278_v58 = vpop.xlane.xlu1 %1277  ;;  %v1275_v60 = vpop.xlane.xlu0 %1274 }
 0xdc8   :  { %2484 = vpow2.f32 %v1296_v56  ;;  %v1288_v44 = vsub.f32 %v1256_v50, %v1278_v58  ;;  %v1287_v63 = vsub.f32 %v1255_v30, %v1275_v60  ;;  %v1457_v60 = vsel %vm539_vm5, %v1443_v53, 0 }
 0xdc9   :  { %2486 = vpow2.f32 %v1292_v54 }
 0xdca   :  { %v1302_v62 = vmul.f32 1.442695, %v1288_v44  ;;  %v1300_v4 = vmul.f32 1.442695, %v1287_v63 }
 0xdcb   :  { %v1357_v1 = vpop.permute.xlu1 %1356  ;;  %v1281_v2 = vpop.xlane.xlu0 %1280 }
 0xdcc   :  { %2488 = vpow2.f32 %v1302_v62  ;;  %v1289_v3 = vsub.f32 %v1257_v38, %v1281_v2  ;;  %2272 = vmatprep.subr.bf16.mxu1 %v1357_v1 }
 0xdcd   :  { %2273 = vmatpush3.bf16.msra.mxu1 %v1357_v1  ;;  %2490 = vpow2.f32 %v1298_v61 }
 0xdce   :  { %v1304_v6 = vmul.f32 1.442695, %v1289_v3 }
 0xdd0   :  { %2492 = vpow2.f32 %v1304_v6 }
 0xdd1   :  { %v2924_v7 = vpop.eup %2480  ;;  %2494 = vpow2.f32 %v1300_v4 }
 0xdd2   :  { %v1312_v10 = vsel %vm340_vm4, %v2924_v7, 0.0  ;;  %v2483_v11 = vpop.eup %2482 }
 0xdd3   :  { %1313 = vadd.xlane.f32.xlu1 %v1312_v10  ;;  %v1306_v17 = vsel %vm340_vm4, %v2483_v11, 0.0 }
 0xdd5   :  { %v2485_v14 = vpop.eup %2484 }
 0xdd6   :  { %v1315_v21 = vsel %vm340_vm4, %v2485_v14, 0.0  ;;  %v2487_v12 = vpop.eup %2486 }
 0xdd7   :  { %1307 = vadd.xlane.f32.xlu1 %v1306_v17  ;;  %1316 = vadd.xlane.f32.xlu0 %v1315_v21  ;;  %v1309_v23 = vsel %vm340_vm4, %v2487_v12, 0.0 }
 0xdd9   :  { %v2930_v22 = vpop.eup %2488 }
 0xdda   :  { %v1324_v35 = vsel %vm340_vm4, %v2930_v22, 0.0  ;;  %v2491_v47 = vpop.eup %2490 }
 0xddb   :  { %1325 = vadd.xlane.f32.xlu1 %v1324_v35  ;;  %1310 = vadd.xlane.f32.xlu0 %v1309_v23  ;;  %v1318_v25 = vsel %vm340_vm4, %v2491_v47, 0.0 }
 0xddd   :  { %v2493_v13 = vpop.eup %2492 }
 0xdde   :  { %v1327_v26 = vsel %vm340_vm4, %v2493_v13, 0.0  ;;  %v2495_v59 = vpop.eup %2494 }
 0xddf   :  { %1319 = vadd.xlane.f32.xlu1 %v1318_v25  ;;  %1328 = vadd.xlane.f32.xlu0 %v1327_v26  ;;  %v1321_v27 = vsel %vm340_vm4, %v2495_v59, 0.0 }
 0xde3   :  { %1322 = vadd.xlane.f32.xlu0 %v1321_v27 }
 0xdf0   :  { %1352 = vrot.lane.b32.xlu1 %v2883_v49, %s2615_s5 }
 0xdf4   :  { %1350 = vrot.lane.b32.xlu1 %v2868_v28, %s2615_s5 }
 0xdf9   :  { %1354 = vrot.lane.b32.xlu0 %v2875_v43, %s2615_s5 }
 0xe5c   :  { %v1314_v42 = vpop.xlane.xlu1 %1313 }
 0xe60   :  { %v1308_v55 = vpop.xlane.xlu1 %1307  ;;  %v1317_v50 = vpop.xlane.xlu0 %1316 }
 0xe61   :  { %2496 = vrcp.f32 %v1308_v55 }
 0xe64   :  { %v1326_v30 = vpop.xlane.xlu1 %1325  ;;  %v1311_v32 = vpop.xlane.xlu0 %1310 }
 0xe65   :  { %2498 = vrcp.f32 %v1311_v32 }
 0xe66   :  { %2500 = vrcp.f32 %v1317_v50 }
 0xe67   :  { %2502 = vrcp.f32 %v1314_v42 }
 0xe68   :  { %v1320_v34 = vpop.xlane.xlu1 %1319  ;;  %v1329_v38 = vpop.xlane.xlu0 %1328 }
 0xe69   :  { %2504 = vrcp.f32 %v1320_v34 }
 0xe6c   :  { %v1323_v5 = vpop.xlane.xlu0 %1322  ;;  %v1353_v49 = vpop.permute.xlu1 %1352 }
 0xe6d   :  { %2506 = vrcp.f32 %v1323_v5 }
 0xe6e   :  { %2508 = vrcp.f32 %v1329_v38  ;;  %v2497_v39 = vpop.eup %2496 }
 0xe6f   :  { %2510 = vrcp.f32 %v1326_v30  ;;  %v1338_v36 = vmul.f32 %v2497_v39, %v2483_v11 }
 0xe70   :  { %v1355_v28 = vpop.permute.xlu0 %1354  ;;  %v1351_v8 = vpop.permute.xlu1 %1350 }
 0xe71   :  { %2274 = vmatprep.subr.bf16.mxu1 %v1355_v28 }
 0xe72   :  { %2275 = vmatpush3.bf16.msra.mxu1 %v1355_v28  ;;  %v2499_v43 = vpop.eup %2498 }
 0xe73   :  { %2276 = vmatprep.subr.bf16.mxu1 %v1353_v49  ;;  %v2501_v15 = vpop.eup %2500  ;;  %v1339_v45 = vmul.f32 %v2499_v43, %v2487_v12 }
 0xe74   :  { %v2503_v46 = vpop.eup %2502  ;;  %v1341_v51 = vmul.f32 %v2501_v15, %v2485_v14 }
 0xe75   :  { %v1346_v48 = vpack.c.bf16 %v1339_v45, %v1338_v36  ;;  %v1340_v16 = vmul.f32 %v2503_v46, %v2924_v7 }
 0xe76   :  { %2277 = vmatpush3.bf16.msra.mxu1 %v1353_v49  ;;  %v2505_v52 = vpop.eup %2504 }
 0xe77   :  { %2278 = vmatprep.subr.bf16.mxu1 %v1351_v8  ;;  %2280 = vmatprep.mubr.msk.bf16.mxu1 %vm340_vm4, %v1346_v48  ;;  %v1347_v56 = vpack.c.bf16 %v1341_v51, %v1340_v16  ;;  %v1342_v57 = vmul.f32 %v2505_v52, %v2491_v47  ;;  %v3003_v52 = vld [vmem:[#allocation7 + $0x70] sm:$0xf] }
 0xe7a   :  { %v2507_v54 = vpop.eup %2506  ;;  %2279 = vmatpush3.bf16.msra.mxu1 %v1351_v8 }
 0xe7b   :  { %v1343_v58 = vmul.f32 %v2507_v54, %v2495_v59  ;;  %2375 = vmatprep.subr.msk.bf16.mxu1 %vm539_vm5, %v1443_v53  ;;  %v2509_v44 = vpop.eup %2508  ;;  %v1573_v54 = vrot.slane %v3003_v52, %v664_v31 }
 0xe7c   :  { %v2511_v62 = vpop.eup %2510  ;;  %v1345_v63 = vmul.f32 %v2509_v44, %v2493_v13 }
 0xe7d   :  { %2281 = vmatmul.mubr.msk.bf16.vlgmr.msra.gmra.mxu1 %vm340_vm4, %v1347_v56  ;;  %v1348_v61 = vpack.c.bf16 %v1343_v58, %v1342_v57  ;;  %v1344_v1 = vmul.f32 %v2511_v62, %v2930_v22 }
 0xe7e   :  { %2289 = vmatpush3.bf16.msra.mxu1 %v1457_v60 }
 0xe7f   :  { %2284 = vmatprep.mubr.msk.bf16.mxu1 %vm340_vm4, %v1348_v61  ;;  %2310 = vmatprep.subr.bf16.mxu1 %v2609_v0  ;;  %v1349_v2 = vpack.c.bf16 %v1345_v63, %v1344_v1 }
 0xe85   :  { %2285 = vmatmul.mubr.msk.bf16.gmra.mxu1 %vm340_vm4, %v1349_v2 }
 0xf3d   :  { %v2282_v3 = vpop.f32.mrf.mxu1 }
 0xf3f   :  { %v1408_v4 = vpop.f32.mrf.mxu1 }
 0xf41   :  { %v2283_v6 = vpop.f32.mrf.mxu1 }
 0xf42   :  { %v1440_v11 = vpack.c.bf16 %v2283_v6, %v2282_v3 }
 0xf43   :  { %v1411_v7 = vpop.f32.mrf.mxu1 }
 0xf44   :  { %v1439_v10 = vpack.c.bf16 %v1411_v7, %v1408_v4 }
 0xf45   :  { %v2286_v14 = vpop.f32.mrf.mxu1 }
 0xf46   :  { %2290 = vmatprep.mubr.msk.bf16.mxu1 %vm234_vm3, %v1439_v10 }
 0xf47   :  { %v1424_v17 = vpop.f32.mrf.mxu1  ;;  %2291 = vmatmul.mubr.msk.bf16.vlgmr.msra.gmra.mxu1 %vm234_vm3, %v1440_v11 }
 0xf49   :  { %v2287_v21 = vpop.f32.mrf.mxu1 }
 0xf4a   :  { %v1442_v23 = vpack.c.bf16 %v2287_v21, %v2286_v14 }
 0xf4b   :  { %v1427_v12 = vpop.f32.mrf.mxu1 }
 0xf4c   :  { %v1441_v35 = vpack.c.bf16 %v1427_v12, %v1424_v17 }
 0xf4e   :  { %2294 = vmatprep.mubr.msk.bf16.mxu1 %vm234_vm3, %v1441_v35 }
 0xf4f   :  { %2295 = vmatmul.mubr.msk.bf16.gmra.mxu1 %vm234_vm3, %v1442_v23 }
 0xf50   :  { %2318 = vmatprep.mubr.msk.bf16.mxu1 %vm2610_vm0, %v2609_v0 }
0x1007   :  { %v2292_v22 = vpop.f32.mrf.mxu1 }
0x1009   :  { %v1493_v47 = vpop.f32.mrf.mxu1 }
0x100b   :  { %v2293_v13 = vpop.f32.mrf.mxu1 }
0x100c   :  { %v1526_v30 = vpack.c.bf16 %v2293_v13, %v2292_v22 }
0x100d   :  { %v1496_v25 = vpop.f32.mrf.mxu1 }
0x100e   :  { %v1525_v32 = vpack.c.bf16 %v1496_v25, %v1493_v47 }
0x100f   :  { %v2296_v26 = vpop.f32.mrf.mxu1 }
0x1011   :  { %v1509_v59 = vpop.f32.mrf.mxu1 }
0x1013   :  { %v2297_v27 = vpop.f32.mrf.mxu1 }
0x1014   :  { %v1528_v42 = vpack.c.bf16 %v2297_v27, %v2296_v26  ;;  %v2438_v27 = vld [vmem:[#allocation5 + $0x90] sm:$0xff]  }
0x1015   :  { %v1512_v55 = vpop.f32.mrf.mxu1 }
0x1016   :  { %v1527_v50 = vpack.c.bf16 %v1512_v55, %v1509_v59  ;;  %1586 = vrot.lane.b32.xlu0 %v1528_v42, %s2616_s6  ;;  %2299 = vmatpush3.bf16.msra.mxu0 %v1528_v42 }
0x1017   :  { %2300 = vmatprep.subr.bf16.mxu0 %v2609_v0 }
0x1018   :  { %1584 = vrot.lane.b32.xlu1 %v1527_v50, %s2616_s6 }
0x101a   :  { %1582 = vrot.lane.b32.xlu0 %v1526_v30, %s2616_s6  ;;  %2301 = vmatpush3.bf16.msra.mxu0 %v1527_v50 }
0x101b   :  { %2302 = vmatprep.subr.bf16.mxu0 %v2609_v0 }
0x101c   :  { %1580 = vrot.lane.b32.xlu1 %v1525_v32, %s2616_s6 }
0x101e   :  { %1641 = vrot.lane.b32.xlu0 %v1528_v42, %s2603_s15  ;;  %2303 = vmatpush3.bf16.msra.mxu0 %v1526_v30 }
0x101f   :  { %2304 = vmatprep.subr.bf16.mxu0 %v2609_v0 }
0x1020   :  { %1696 = vrot.lane.b32.xlu1 %v1528_v42, %s2617_s7  ;;  %v2440_v42 = vld [vmem:[#allocation5 + $0xb0] sm:$0xff]  }
0x1022   :  { %1639 = vrot.lane.b32.xlu0 %v1527_v50, %s2603_s15  ;;  %2305 = vmatpush3.bf16.msra.mxu0 %v1525_v32 }
0x1023   :  { %2322 = vmatprep.subr.bf16.mxu0 %v2609_v0 }
0x1024   :  { %1694 = vrot.lane.b32.xlu1 %v1527_v50, %s2617_s7 }
0x1025   :  { %2307 = vmatmul.mubr.msk.bf16.vlgmr.msra.gmra.mxu0 %vm340_vm4, %v2782_v18 }
0x1026   :  { %1637 = vrot.lane.b32.xlu0 %v1526_v30, %s2603_s15  ;;  %2330 = vmatprep.mubr.msk.bf16.mxu0 %vm2610_vm0, %v2609_v0 }
0x1028   :  { %1692 = vrot.lane.b32.xlu1 %v1526_v30, %s2617_s7 }
0x102a   :  { %1635 = vrot.lane.b32.xlu0 %v1525_v32, %s2603_s15 }
0x102c   :  { %1690 = vrot.lane.b32.xlu1 %v1525_v32, %s2617_s7 }
0x1088   :  { %v1587_v34 = vpop.permute.xlu0 %1586 }
0x1089   :  { %2311 = vmatpush3.bf16.msra.mxu1 %v1587_v34 }
0x108a   :  { %v1585_v38 = vpop.permute.xlu1 %1584  ;;  %2312 = vmatprep.subr.bf16.mxu1 %v2609_v0 }
0x108c   :  { %v1583_v5 = vpop.permute.xlu0 %1582 }
0x108d   :  { %2313 = vmatpush3.bf16.msra.mxu1 %v1585_v38 }
0x108e   :  { %v1581_v49 = vpop.permute.xlu1 %1580  ;;  %2314 = vmatprep.subr.bf16.mxu1 %v2609_v0 }
0x1090   :  { %v1642_v18 = vpop.permute.xlu0 %1641 }
0x1091   :  { %2315 = vmatpush3.bf16.msra.mxu1 %v1583_v5  ;;  %2323 = vmatpush3.bf16.msra.mxu0 %v1642_v18 }
0x1092   :  { %v1697_v28 = vpop.permute.xlu1 %1696  ;;  %2316 = vmatprep.subr.bf16.mxu1 %v2609_v0  ;;  %2324 = vmatprep.subr.bf16.mxu0 %v2609_v0 }
0x1094   :  { %v1640_v39 = vpop.permute.xlu0 %1639 }
0x1095   :  { %2317 = vmatpush3.bf16.msra.mxu1 %v1581_v49  ;;  %2325 = vmatpush3.bf16.msra.mxu0 %v1640_v39  ;;  %v1776_v49 = vrot.slane %v3003_v52, %v892_v37  ;;  %v1782_v39 = vrot.slane %v3003_v52, %v898_v40  ;;  %v2443_v37 = vld [vmem:[#allocation5 + $0x98] sm:$0xff]  }
0x1096   :  { %2326 = vmatprep.subr.bf16.mxu0 %v2609_v0  ;;  %2334 = vmatprep.subr.bf16.mxu1 %v2609_v0  ;;  %v1695_v43 = vpop.permute.xlu1 %1694 }
0x1098   :  { %v1638_v15 = vpop.permute.xlu0 %1637  ;;  %2319 = vmatmul.mubr.msk.bf16.vlgmr.msra.gmra.mxu1 %vm340_vm4, %v2799_v24 }
0x1099   :  { %2327 = vmatpush3.bf16.msra.mxu0 %v1638_v15  ;;  %2335 = vmatpush3.bf16.msra.mxu1 %v1697_v28 }
0x109a   :  { %2328 = vmatprep.subr.bf16.mxu0 %v2609_v0  ;;  %2336 = vmatprep.subr.bf16.mxu1 %v2609_v0  ;;  %v1693_v45 = vpop.permute.xlu1 %1692 }
0x109b   :  { %2342 = vmatprep.mubr.msk.bf16.mxu1 %vm2610_vm0, %v2609_v0 }
0x109c   :  { %v1636_v36 = vpop.permute.xlu0 %1635 }
0x109d   :  { %2329 = vmatpush3.bf16.msra.mxu0 %v1636_v36  ;;  %2337 = vmatpush3.bf16.msra.mxu1 %v1695_v43 }
0x109e   :  { %2338 = vmatprep.subr.bf16.mxu1 %v2609_v0  ;;  %2346 = vmatprep.subr.bf16.mxu0 %v2609_v0  ;;  %v1691_v24 = vpop.permute.xlu1 %1690 }
0x10a0   :  { %2331 = vmatmul.mubr.msk.bf16.vlgmr.msra.gmra.mxu0 %vm340_vm4, %v2809_v29 }
0x10a1   :  { %2339 = vmatpush3.bf16.msra.mxu1 %v1693_v45  ;;  %2350 = vmatprep.mubr.msk.bf16.mxu0 %vm2610_vm0, %v2609_v0 }
0x10a2   :  { %2340 = vmatprep.subr.bf16.mxu1 %v2609_v0  ;;  %2347 = vmatpush3.bf16.msra.mxu0 %v2438_v27 }
0x10a3   :  { %2348 = vmatprep.subr.bf16.mxu0 %v2609_v0 }
0x10a5   :  { %2341 = vmatpush3.bf16.msra.mxu1 %v1691_v24 }
0x10a6   :  { %2354 = vmatprep.subr.bf16.mxu1 %v2609_v0 }
0x10a8   :  { %2343 = vmatmul.mubr.msk.bf16.vlgmr.msra.gmra.mxu1 %vm340_vm4, %v2818_v33 }
0x10a9   :  { %2362 = vmatprep.mubr.msk.bf16.mxu1 %vm2610_vm0, %v2609_v0  ;;  %2355 = vmatpush3.bf16.msra.mxu1 %v2440_v42 }
0x10aa   :  { %2356 = vmatprep.subr.bf16.mxu1 %v2609_v0 }
0x10e5   :  { %v1563_v46 = vpop.f32.mrf.mxu0 }
0x10e6   :  { %v1574_v58 = vadd.f32 %v1573_v54, %v1563_v46 }
0x10e7   :  { %v2308_v8 = vpop.f32.mrf.mxu0 }
0x10e8   :  { %v2441_v8 = vld [vmem:[#allocation5 + $0xa8] sm:$0xff]  }
0x10e9   :  { %v1566_v48 = vpop.f32.mrf.mxu0  ;;  %2357 = vmatpush3.bf16.msra.mxu1 %v2441_v8 }
0x10ea   :  { %v1575_v62 = vadd.f32 %v1573_v54, %v1566_v48  ;;  %2358 = vmatprep.subr.bf16.mxu1 %v2609_v0  ;;  %v2442_v48 = vld [vmem:[#allocation5 + $0xa0] sm:$0xff]  }
0x10eb   :  { %v2309_v29 = vpop.f32.mrf.mxu0 }
0x10ec   :  { %v2009_v29 = vld [vmem:[#allocation7 + $0x78] ss:$0 sm:$0xff] }
0x10ed   :  { %2359 = vmatpush3.bf16.msra.mxu1 %v2442_v48 }
0x10ee   :  { %2360 = vmatprep.subr.bf16.mxu1 %v2609_v0 }
0x10f1   :  { %2361 = vmatpush3.bf16.msra.mxu1 %v2443_v37 }
0x1158   :  { %v1626_v51 = vpop.f32.mrf.mxu1 }
0x1159   :  { %v1633_v44 = vadd.f32 %v1626_v51, %v1574_v58 }
0x115a   :  { %v2320_v53 = vpop.f32.mrf.mxu1 }
0x115c   :  { %v1629_v16 = vpop.f32.mrf.mxu1 }
0x115d   :  { %v1634_v2 = vadd.f32 %v1629_v16, %v1575_v62 }
0x115e   :  { %v2321_v56 = vpop.f32.mrf.mxu1 }
0x1160   :  { %v1681_v57 = vpop.f32.mrf.mxu0 }
0x1161   :  { %v1688_v63 = vadd.f32 %v1681_v57, %v1633_v44 }
0x1162   :  { %v2332_v33 = vpop.f32.mrf.mxu0 }
0x1164   :  { %v1684_v60 = vpop.f32.mrf.mxu0 }
0x1165   :  { %v1689_v6 = vadd.f32 %v1684_v60, %v1634_v2  ;;  %v1865_v60 = vrot.slane %v3003_v52, %v981_v9 }
0x1166   :  { %v2333_v61 = vpop.f32.mrf.mxu0 }
0x1168   :  { %v1736_v1 = vpop.f32.mrf.mxu1 }
0x1169   :  { %v1743_v3 = vadd.f32 %v1736_v1, %v1688_v63 }
0x116a   :  { %v2344_v4 = vpop.f32.mrf.mxu1 }
0x116b   :  { %v1745_v7 = vadd.f32 %v1743_v3, %v2861_v19 }
0x116c   :  { %v1739_v10 = vpop.f32.mrf.mxu1 }
0x116d   :  { %v1744_v11 = vadd.f32 %v1739_v10, %v1689_v6  ;;  %v1747_v31 = vsel %vm153_vm2, %v1745_v7, 0.0 }
0x116e   :  { %v2345_v14 = vpop.f32.mrf.mxu1  ;;  %1748 = vadd.xlane.f32.xlu0 %v1747_v31 }
0x116f   :  { %v1746_v17 = vadd.f32 %v1744_v11, %v2863_v20  ;;  %v2439_v20 = vld [vmem:[#allocation5 + $0x88] sm:$0xff]  }
0x1170   :  { %2349 = vmatpush3.bf16.msra.mxu0 %v2439_v20 }
0x1171   :  { %v1750_v21 = vsel %vm153_vm2, %v1746_v17, 0.0 }
0x1172   :  { %1751 = vadd.xlane.f32.xlu1 %v1750_v21 }
0x11f7   :  { %v1749_v12 = vpop.xlane.xlu0 %1748 }
0x11f8   :  { %v1753_v35 = vmul.f32 0.03125, %v1749_v12 }
0x11fa   :  { %v1755_v23 = vsub.f32 %v1745_v7, %v1753_v35 }
0x11fb   :  { %v1752_v22 = vpop.xlane.xlu1 %1751 }
0x11fc   :  { %v1754_v47 = vmul.f32 0.03125, %v1752_v22  ;;  %v1757_v13 = vmul.f32 %v1755_v23, %v1755_v23 }
0x11fe   :  { %v1756_v25 = vsub.f32 %v1746_v17, %v1754_v47  ;;  %v1759_v19 = vsel %vm153_vm2, %v1757_v13, 0.0 }
0x11ff   :  { %1760 = vadd.xlane.f32.xlu0 %v1759_v19 }
0x1200   :  { %v1758_v26 = vmul.f32 %v1756_v25, %v1756_v25 }
0x1202   :  { %v1762_v59 = vsel %vm153_vm2, %v1758_v26, 0.0 }
0x1203   :  { %1763 = vadd.xlane.f32.xlu0 %v1762_v59 }
0x1288   :  { %v1761_v55 = vpop.xlane.xlu0 %1760 }
0x1289   :  { %v1765_v50 = vmul.f32 0.03125, %v1761_v55 }
0x128b   :  { %v1767_v30 = vadd.f32 1e-05, %v1765_v50 }
0x128c   :  { %v1764_v32 = vpop.xlane.xlu0 %1763 }
0x128d   :  { %2512 = vrsqrt.f32 %v1767_v30  ;;  %v1766_v34 = vmul.f32 0.03125, %v1764_v32 }
0x128f   :  { %v1768_v38 = vadd.f32 1e-05, %v1766_v34 }
0x1291   :  { %2514 = vrsqrt.f32 %v1768_v38 }
0x129a   :  { %v2513_v5 = vpop.eup %2512 }
0x129b   :  { %v1771_v18 = vmul.f32 %v2513_v5, %v1755_v23 }
0x129d   :  { %v1777_v15 = vmul.f32 %v1776_v49, %v1771_v18 }
0x129e   :  { %v2515_v28 = vpop.eup %2514 }
0x129f   :  { %v1772_v43 = vmul.f32 %v2515_v28, %v1756_v25  ;;  %v1783_v45 = vadd.f32 %v1782_v39, %v1777_v15 }
0x12a1   :  { %v1778_v36 = vmul.f32 %v1776_v49, %v1772_v43 }
0x12a3   :  { %v1784_v24 = vadd.f32 %v1782_v39, %v1778_v36 }
0x12a5   :  { %v1785_v46 = vpack.c.bf16 %v1784_v24, %v1783_v45 }
0x12a7   :  { %2351 = vmatmul.mubr.msk.bf16.vlgmr.msra.gmra.mxu0 %vm153_vm2, %v1785_v46 }
0x1367   :  { %v1844_v40 = vpop.f32.mrf.mxu0 }
0x1368   :  { %v1845_v53 = vadd.f32 %v2009_v29, %v1844_v40 }
0x1369   :  { %v2352_v51 = vpop.f32.mrf.mxu0 }
0x136a   :  { %v1851_v57 = vmax.f32 %v1845_v53, 0.0 }
0x136b   :  { %v1847_v16 = vpop.f32.mrf.mxu0 }
0x136c   :  { %v1848_v54 = vadd.f32 %v2009_v29, %v1847_v16 }
0x136d   :  { %v2353_v56 = vpop.f32.mrf.mxu0 }
0x136e   :  { %v1852_v58 = vmax.f32 %v1848_v54, 0.0 }
0x1370   :  { %v1853_v33 = vpack.c.bf16 %v1852_v58, %v1851_v57 }
0x1372   :  { %2363 = vmatmul.mubr.msk.bf16.vlgmr.msra.gmra.mxu1 %vm340_vm4, %v1853_v33 }
0x1432   :  { %v1927_v44 = vpop.f32.mrf.mxu1 }
0x1433   :  { %v1928_v0 = vadd.f32 %v1927_v44, %v1865_v60 }
0x1434   :  { %v2364_v61 = vpop.f32.mrf.mxu1 }
0x1435   :  { %1934 = vst.msk [vmem:[#allocation8] sm:$0xff] %vm153_vm2, %v1928_v0 }
0x1436   :  { %v1930_v62 = vpop.f32.mrf.mxu1 }
0x1437   :  { %v1931_v63 = vadd.f32 %v1930_v62, %v1865_v60 }
0x1438   :  { %v2365_v1 = vpop.f32.mrf.mxu1 }
0x1439   :  { %1935 = vst.msk [vmem:[#allocation8 + $0x8] sm:$0xff] %vm153_vm2, %v1931_v63 }
0x143a   :  { %2587 = shalt.err (!%p2584_p5)
}
0x143b   :  { %1947 = dma.vmem_to_hbm [thread:$0]  %s1942_s9, 256, %s3040_s3, [#allocation4], %s2606_s22, %s2606_s22, %s2607_s23  }
0x143c   :  { %2600 = dma.done.wait [#allocation4], 256  }
0x143d   :  { %2601 = vsyncadd [#allocation4], 4294967040 }
0x143e   :  { %1951 = vsyncpa [#allocation3], 1 }
0x143f   :  { %1952 = vsyncpa [#allocation6], 1 }
0x1440   :  { %1953 = vsyncpa [#allocation4], 1 }

</bundles_post_ra>
